<compile_context>
chip_gen: v7x
topology: tpu7x:2x2x1
jax: 0.10.0
libtpu: 0.0.40
codegen_flags: <defaults>
</compile_context>

<pallas_src>
import functools

import numpy as np
import jax
import jax.numpy as jnp
from jax.experimental import pallas as pl
from jax.experimental.pallas import tpu as pltpu


def _round_up(x, m):
    return (x + m - 1) // m * m


def prior_kernel(ze_ref, psum_ref, pelem_ref,
                 e_ref, zi_ref, zq_ref, nsum_ref, nelem_ref, loss_ref,
                 psq_sc,
                 *, mu, n_valid, m_valid, d_valid, n_padded):
    pid = pl.program_id(0)
    last = pl.num_programs(0) - 1

    # ---- init: hoisted codebook-invariant work + zero the accumulators ----
    @pl.when(pid == 0)
    def _init():
        psum = psum_ref[...]                       # (Mp, Dp)
        # reciprocal-then-multiply: Mp divides instead of Mp*Dp divides.
        # TODO(synk): no epsilon guard on prior_elem -> 0 (matches the PyTorch reference).
        inv_elem = 1.0 / pelem_ref[...]            # (Mp, 1)
        prior = psum * inv_elem                    # (Mp, Dp)
        e_ref[...] = prior                         # resident; doubles as prior scratch
        psq_sc[...] = jnp.sum(prior * prior, axis=1, keepdims=True)   # (Mp, 1)
        nsum_ref[...] = jnp.zeros_like(nsum_ref)
        nelem_ref[...] = jnp.zeros_like(nelem_ref)
        loss_ref[...] = jnp.zeros_like(loss_ref)

    ze = ze_ref[...]                               # (TN, Dp) f32
    prior = e_ref[...]                             # (Mp, Dp) f32 (resident)
    tn = ze.shape[0]
    mp = prior.shape[0]

    # scoreT[m, t] = ||e_m||^2 - 2 <e_m, ze_t>
    # (the per-sample ||ze_t||^2 term is constant along m -> dropped for argmin)
    cross_t = jax.lax.dot_general(prior, ze, (((1,), (1,)), ((), ())),
                                  preferred_element_type=jnp.float32)   # (Mp, TN)
    score = psq_sc[...] - 2.0 * cross_t

    row_ids = jax.lax.broadcasted_iota(jnp.int32, (mp, tn), 0)
    if m_valid < mp:
        # padded codebook rows never win the argmin
        score = jnp.where(row_ids < m_valid, score, jnp.inf)

    # argmin over M (first occurrence, matching torch.min tie-breaking)
    min_s = jnp.min(score, axis=0, keepdims=True)                        # (1, TN)
    zi_row = jnp.min(jnp.where(score <= min_s, row_ids, mp),
                     axis=0, keepdims=True)                              # (1, TN) int32
    zi_ref[...] = zi_row                                                 # lane-dense store

    onehot_t = (row_ids == zi_row).astype(jnp.float32)                   # (Mp, TN)
    if n_valid < n_padded:
        # zero out padded sample columns so they don't touch the EMA stats / loss
        col_global = pid * tn + jax.lax.broadcasted_iota(jnp.int32, (1, tn), 1)
        onehot_t = onehot_t * (col_global < n_valid).astype(jnp.float32)

    # zq = onehot @ prior   (one-hot gather on the MXU)
    zq = jax.lax.dot_general(onehot_t, prior, (((0,), (0,)), ((), ())),
                             preferred_element_type=jnp.float32)         # (TN, Dp)
    zq_ref[...] = zq

    # accumulate EMA statistics and loss into the resident output buffers
    nsum_ref[...] += jax.lax.dot_general(onehot_t, ze, (((1,), (0,)), ((), ())),
                                         preferred_element_type=jnp.float32)  # (Mp, Dp)
    nelem_ref[...] += jnp.sum(onehot_t, axis=1, keepdims=True)           # (Mp, 1)
    diff = ze - zq
    loss_ref[...] += jnp.sum(diff * diff, keepdims=True)                 # (1, 1)

    # ---- finalize: EMA blend + loss normalization (only once) ----
    @pl.when(pid == last)
    def _finalize():
        nsum_ref[...] = mu * psum_ref[...] + (1.0 - mu) * nsum_ref[...]
        nelem_ref[...] = mu * pelem_ref[...] + (1.0 - mu) * nelem_ref[...]
        loss_ref[...] = loss_ref[...] * (1.0 / float(n_valid * d_valid))


def prior_forward(ze, prior_sum, prior_elem, mu=0.99, tile_n=512):
    """Returns (e, zi, zq, new_prior_sum, new_prior_elem, commit_loss)."""
    N, D = ze.shape
    M = prior_sum.shape[0]

    # lane-dense padding: M, D to multiples of 128; N tiled in multiples of 128
    Dp = _round_up(D, 128)
    Mp = _round_up(M, 128)
    TN = _round_up(min(int(tile_n), _round_up(N, 128)), 128)
    Np = _round_up(N, TN)
    ntiles = Np // TN

    ze_p = jnp.zeros((Np, Dp), jnp.float32).at[:N, :D].set(ze.astype(jnp.float32))
    psum_p = jnp.zeros((Mp, Dp), jnp.float32).at[:M, :D].set(prior_sum.astype(jnp.float32))
    # padded codebook counts = 1 so the (masked-out) padded prior rows stay finite
    pelem_p = jnp.ones((Mp, 1), jnp.float32).at[:M, 0].set(prior_elem.astype(jnp.float32))

    out_shapes = (
        jax.ShapeDtypeStruct((Mp, Dp), jnp.float32),   # e (prior)
        jax.ShapeDtypeStruct((1, Np), jnp.int32),      # zi (lane-dense row)
        jax.ShapeDtypeStruct((Np, Dp), jnp.float32),   # zq
        jax.ShapeDtypeStruct((Mp, Dp), jnp.float32),   # new prior_sum
        jax.ShapeDtypeStruct((Mp, 1), jnp.float32),    # new prior_elem
        jax.ShapeDtypeStruct((1, 1), jnp.float32),     # commit_loss
    )

    in_specs = [
        pl.BlockSpec((TN, Dp), lambda i: (i, 0)),      # ze: tiled over N
        pl.BlockSpec((Mp, Dp), lambda i: (0, 0)),      # prior_sum: resident
        pl.BlockSpec((Mp, 1), lambda i: (0, 0)),       # prior_elem: resident
    ]
    out_specs = (
        pl.BlockSpec((Mp, Dp), lambda i: (0, 0)),      # e: resident
        pl.BlockSpec((1, TN), lambda i: (0, i)),       # zi: tiled over N
        pl.BlockSpec((TN, Dp), lambda i: (i, 0)),      # zq: tiled over N
        pl.BlockSpec((Mp, Dp), lambda i: (0, 0)),      # new prior_sum: resident accumulator
        pl.BlockSpec((Mp, 1), lambda i: (0, 0)),       # new prior_elem: resident accumulator
        pl.BlockSpec((1, 1), lambda i: (0, 0)),        # loss: resident accumulator
    )

    # explicit VMEM budget (sized for v7x's 64 MiB physical as well)
    fl = 4
    tile_io = 2 * (2 * TN * Dp * fl + TN * 4)          # ze + zq double-buffered, zi
    resident = 3 * Mp * Dp * fl + 4 * Mp * fl          # psum, e, nsum (+ pelem/psq/nelem)
    interm = 4 * Mp * TN * fl                          # score / onehot / cross temporaries
    vmem_limit = int(min(max(2 * (tile_io + resident + interm), 8 << 20), 56 << 20))

    cost = pl.CostEstimate(
        flops=int(6 * Np * Mp * Dp),                   # 3 MXU matmuls per tile
        transcendentals=0,
        bytes_accessed=int(fl * (2 * Np * Dp + Np + 3 * Mp * Dp + 2 * Mp + 1)),
    )

    kern = functools.partial(prior_kernel, mu=float(mu), n_valid=N,
                             m_valid=M, d_valid=D, n_padded=Np)

    e_p, zi_p, zq_p, nsum_p, nelem_p, loss_p = pl.pallas_call(
        kern,
        out_shape=out_shapes,
        grid_spec=pltpu.PrefetchScalarGridSpec(
            num_scalar_prefetch=0,
            grid=(ntiles,),
            in_specs=in_specs,
            out_specs=out_specs,
            scratch_shapes=[pltpu.VMEM((Mp, 1), jnp.float32)],   # ||prior||^2 column
        ),
        compiler_params=pltpu.CompilerParams(
            dimension_semantics=("arbitrary",),
            vmem_limit_bytes=vmem_limit,
        ),
        cost_estimate=cost,
    )(ze_p, psum_p, pelem_p)

    e = e_p[:M, :D]
    zi = zi_p[0, :N]
    zq = zq_p[:N, :D]
    nsum = nsum_p[:M, :D]
    nelem = nelem_p[:M, 0]
    loss = loss_p[0, 0]
    return e, zi, zq, nsum, nelem, loss


def prior_reference(ze, prior_sum, prior_elem, mu):
    prior = prior_sum / prior_elem[:, None]
    dist = ((ze ** 2).sum(1, keepdims=True) - 2 * ze @ prior.T
            + (prior.T ** 2).sum(0, keepdims=True))
    zi = jnp.argmin(dist, axis=1)
    zq = prior[zi]
    oh = jax.nn.one_hot(zi, prior_sum.shape[0], dtype=jnp.float32)
    nsum = mu * prior_sum + (1 - mu) * (oh.T @ ze)
    nelem = mu * prior_elem + (1 - mu) * oh.sum(0)
    loss = jnp.mean((ze - zq) ** 2)
    return prior, zi, zq, nsum, nelem, loss


def _check(ze, prior_sum, prior_elem, mu, tile_n):
    outs = jax.block_until_ready(prior_forward(ze, prior_sum, prior_elem,
                                               mu=mu, tile_n=tile_n))
    refs = prior_reference(ze, prior_sum, prior_elem, mu)
    e, zi, zq, nsum, nelem, loss = [np.asarray(o) for o in outs]
    e_r, zi_r, zq_r, nsum_r, nelem_r, loss_r = [np.asarray(r) for r in refs]
    assert np.allclose(e, e_r, rtol=1e-5, atol=1e-5)
    assert np.array_equal(zi, zi_r)
    assert np.allclose(zq, zq_r, rtol=1e-5, atol=1e-5)
    assert np.allclose(nsum, nsum_r, rtol=1e-5, atol=1e-5)
    assert np.allclose(nelem, nelem_r, rtol=1e-5, atol=1e-5)
    assert np.allclose(loss, loss_r, rtol=1e-5, atol=1e-5)


if __name__ == "__main__":
    key = jax.random.PRNGKey(0)
    k1, k2, k3, k4, k5 = jax.random.split(key, 5)

    # Case 1: small shapes consistent with the module (single N tile).
    M, z_dim, N = 16, 32, 8
    prior_sum = jax.random.normal(k1, (M, z_dim), jnp.float32)    # torch.randn(M, z_dim)
    prior_elem = jnp.ones((M,), jnp.float32)                      # torch.ones(M)
    ze = jax.random.normal(k2, (N, z_dim), jnp.float32)           # data['z']
    _check(ze, prior_sum, prior_elem, mu=0.99, tile_n=512)

    # Case 2: multi-tile grid over N with a padded last tile (exercises the
    # resident accumulators, sample masking and codebook-row masking).
    M2, z_dim2, N2 = 20, 48, 300
    prior_sum2 = jax.random.normal(k3, (M2, z_dim2), jnp.float32)
    prior_elem2 = jax.random.uniform(k4, (M2,), jnp.float32, 0.5, 1.5)
    ze2 = jax.random.normal(k5, (N2, z_dim2), jnp.float32)
    _check(ze2, prior_sum2, prior_elem2, mu=0.95, tile_n=128)

    print("KERNEL_OK")
</pallas_src>

<mosaic_0001>
module attributes {stable_mosaic.version = 11 : i64} {
  func.func @prior_kernel(%arg0: i32, %arg1: memref<128x128xf32, #tpu.memory_space<vmem>>, %arg2: memref<128x128xf32, #tpu.memory_space<vmem>>, %arg3: memref<128x1xf32, #tpu.memory_space<vmem>>, %arg4: memref<128x128xf32, #tpu.memory_space<vmem>>, %arg5: memref<1x128xi32, #tpu.memory_space<vmem>>, %arg6: memref<128x128xf32, #tpu.memory_space<vmem>>, %arg7: memref<128x128xf32, #tpu.memory_space<vmem>>, %arg8: memref<128x1xf32, #tpu.memory_space<vmem>>, %arg9: memref<1x1xf32, #tpu.memory_space<vmem>>, %arg10: memref<128x1xf32, #tpu.memory_space<vmem>>) attributes {dimension_semantics = [#tpu.dimension_semantics<arbitrary>], iteration_bounds = array<i64: 1>, scalar_prefetch = 0 : i64, scratch_operands = 1 : i64, tpu.core_type = #tpu.core_type<tc>, window_params = [{transform_indices = @transform_0, window_bounds = array<i64: 128, 128>}, {pipeline_mode = #tpu.pipeline_mode<synchronous>, transform_indices = @transform_1, window_bounds = array<i64: 128, 128>}, {pipeline_mode = #tpu.pipeline_mode<synchronous>, transform_indices = @transform_2, window_bounds = array<i64: 128, 1>}, {pipeline_mode = #tpu.pipeline_mode<synchronous>, transform_indices = @transform_3, window_bounds = array<i64: 128, 128>}, {transform_indices = @transform_4, window_bounds = array<i64: 1, 128>}, {transform_indices = @transform_5, window_bounds = array<i64: 128, 128>}, {pipeline_mode = #tpu.pipeline_mode<synchronous>, transform_indices = @transform_6, window_bounds = array<i64: 128, 128>}, {pipeline_mode = #tpu.pipeline_mode<synchronous>, transform_indices = @transform_7, window_bounds = array<i64: 128, 1>}, {pipeline_mode = #tpu.pipeline_mode<synchronous>, transform_indices = @transform_8, window_bounds = array<i64: 1, 1>}]} {
    %c0_i32 = arith.constant 0 : i32
    %0 = arith.cmpi eq, %arg0, %c0_i32 : i32
    %1 = arith.extui %0 : i1 to i32
    %c0_i32_0 = arith.constant 0 : i32
    %2 = arith.cmpi ne, %1, %c0_i32_0 : i32
    scf.if %2 {
      %c0_33 = arith.constant 0 : index
      %c0_34 = arith.constant 0 : index
      %63 = vector.load %arg2[%c0_33, %c0_34] : memref<128x128xf32, #tpu.memory_space<vmem>>, vector<128x128xf32>
      %c0_35 = arith.constant 0 : index
      %c0_36 = arith.constant 0 : index
      %64 = vector.load %arg3[%c0_35, %c0_36] : memref<128x1xf32, #tpu.memory_space<vmem>>, vector<128x1xf32>
      %cst_37 = arith.constant 1.000000e+00 : f32
      %65 = vector.broadcast %cst_37 : f32 to vector<128x1xf32>
      %66 = arith.divf %65, %64 : vector<128x1xf32>
      %67 = vector.broadcast %66 : vector<128x1xf32> to vector<128x128xf32>
      %68 = arith.mulf %63, %67 : vector<128x128xf32>
      %c0_38 = arith.constant 0 : index
      %c0_39 = arith.constant 0 : index
      %69 = vector.load %arg4[%c0_38, %c0_39] : memref<128x128xf32, #tpu.memory_space<vmem>>, vector<128x128xf32>
      tpu.vector_store %arg4[%c0_38, %c0_39], %68 {strides = array<i32>} : memref<128x128xf32, #tpu.memory_space<vmem>>, vector<128x128xf32>,
      %70 = arith.mulf %68, %68 : vector<128x128xf32>
      %cst_40 = arith.constant dense<0.000000e+00> : vector<128xf32>
      %71 = vector.multi_reduction <add>, %70, %cst_40 [1] : vector<128x128xf32> to vector<128xf32>
      %72 = vector.shape_cast %71 : vector<128xf32> to vector<128x1xf32>
      %c0_41 = arith.constant 0 : index
      %c0_42 = arith.constant 0 : index
      %73 = vector.load %arg10[%c0_41, %c0_42] : memref<128x1xf32, #tpu.memory_space<vmem>>, vector<128x1xf32>
      tpu.vector_store %arg10[%c0_41, %c0_42], %72 {strides = array<i32>} : memref<128x1xf32, #tpu.memory_space<vmem>>, vector<128x1xf32>,
      %cst_43 = arith.constant 0.000000e+00 : f32
      %74 = vector.broadcast %cst_43 : f32 to vector<128x128xf32>
      %c0_44 = arith.constant 0 : index
      %c0_45 = arith.constant 0 : index
      %75 = vector.load %arg7[%c0_44, %c0_45] : memref<128x128xf32, #tpu.memory_space<vmem>>, vector<128x128xf32>
      tpu.vector_store %arg7[%c0_44, %c0_45], %74 {strides = array<i32>} : memref<128x128xf32, #tpu.memory_space<vmem>>, vector<128x128xf32>,
      %cst_46 = arith.constant 0.000000e+00 : f32
      %76 = vector.broadcast %cst_46 : f32 to vector<128x1xf32>
      %c0_47 = arith.constant 0 : index
      %c0_48 = arith.constant 0 : index
      %77 = vector.load %arg8[%c0_47, %c0_48] : memref<128x1xf32, #tpu.memory_space<vmem>>, vector<128x1xf32>
      tpu.vector_store %arg8[%c0_47, %c0_48], %76 {strides = array<i32>} : memref<128x1xf32, #tpu.memory_space<vmem>>, vector<128x1xf32>,
      %cst_49 = arith.constant 0.000000e+00 : f32
      %78 = vector.broadcast %cst_49 : f32 to vector<1x1xf32>
      %c0_50 = arith.constant 0 : index
      %c0_51 = arith.constant 0 : index
      %79 = vector.load %arg9[%c0_50, %c0_51] : memref<1x1xf32, #tpu.memory_space<vmem>>, vector<1x1xf32>
      tpu.vector_store %arg9[%c0_50, %c0_51], %78 {strides = array<i32>} : memref<1x1xf32, #tpu.memory_space<vmem>>, vector<1x1xf32>,
    } else {
    }
    %c0 = arith.constant 0 : index
    %c0_1 = arith.constant 0 : index
    %3 = vector.load %arg1[%c0, %c0_1] : memref<128x128xf32, #tpu.memory_space<vmem>>, vector<128x128xf32>
    %c0_2 = arith.constant 0 : index
    %c0_3 = arith.constant 0 : index
    %4 = vector.load %arg4[%c0_2, %c0_3] : memref<128x128xf32, #tpu.memory_space<vmem>>, vector<128x128xf32>
    %cst = arith.constant dense<0.000000e+00> : vector<128x128xf32>
    %5 = tpu.matmul %4, %3, %cst {dimension_numbers = #tpu.dot_dimension_numbers<[1], [1], [0], [0], [0, 0, 1, 0], [], []>} : vector<128x128xf32>, vector<128x128xf32>, vector<128x128xf32> -> vector<128x128xf32>
    %c0_4 = arith.constant 0 : index
    %c0_5 = arith.constant 0 : index
    %6 = vector.load %arg10[%c0_4, %c0_5] : memref<128x1xf32, #tpu.memory_space<vmem>>, vector<128x1xf32>
    %cst_6 = arith.constant 2.000000e+00 : f32
    %7 = vector.broadcast %cst_6 : f32 to vector<128x128xf32>
    %8 = arith.mulf %7, %5 : vector<128x128xf32>
    %9 = vector.broadcast %6 : vector<128x1xf32> to vector<128x128xf32>
    %10 = arith.subf %9, %8 : vector<128x128xf32>
    %11 = tpu.iota {dimensions = array<i32: 0>} : vector<128x128xi32>
    %c16_i32 = arith.constant 16 : i32
    %12 = vector.broadcast %c16_i32 : i32 to vector<128x128xi32>
    %13 = arith.cmpi slt, %11, %12 : vector<128x128xi32>
    %cst_7 = arith.constant 0x7F800000 : f32
    %14 = vector.broadcast %cst_7 : f32 to vector<128x128xf32>
    %15 = arith.select %13, %10, %14 : vector<128x128xi1>, vector<128x128xf32>
    %cst_8 = arith.constant dense<0x7F800000> : vector<128xf32>
    %16 = vector.multi_reduction <minimumf>, %15, %cst_8 [0] : vector<128x128xf32> to vector<128xf32>
    %17 = vector.shape_cast %16 : vector<128xf32> to vector<1x128xf32>
    %18 = vector.broadcast %17 : vector<1x128xf32> to vector<128x128xf32>
    %19 = arith.cmpf ole, %15, %18 : vector<128x128xf32>
    %c128_i32 = arith.constant 128 : i32
    %20 = vector.broadcast %c128_i32 : i32 to vector<128x128xi32>
    %21 = arith.select %19, %11, %20 : vector<128x128xi1>, vector<128x128xi32>
    %cst_9 = arith.constant dense<2147483647> : vector<128xi32>
    %22 = vector.multi_reduction <minsi>, %21, %cst_9 [0] : vector<128x128xi32> to vector<128xi32>
    %23 = vector.shape_cast %22 : vector<128xi32> to vector<1x128xi32>
    %c0_10 = arith.constant 0 : index
    %c0_11 = arith.constant 0 : index
    %24 = vector.load %arg5[%c0_10, %c0_11] : memref<1x128xi32, #tpu.memory_space<vmem>>, vector<1x128xi32>
    tpu.vector_store %arg5[%c0_10, %c0_11], %23 {strides = array<i32>} : memref<1x128xi32, #tpu.memory_space<vmem>>, vector<1x128xi32>,
    %25 = vector.broadcast %23 : vector<1x128xi32> to vector<128x128xi32>
    %26 = arith.cmpi eq, %11, %25 : vector<128x128xi32>
    %27 = arith.extui %26 : vector<128x128xi1> to vector<128x128xi32>
    %28 = arith.sitofp %27 : vector<128x128xi32> to vector<128x128xf32>
    %c128_i32_12 = arith.constant 128 : i32
    %29 = arith.muli %arg0, %c128_i32_12 : i32
    %30 = tpu.iota {dimensions = array<i32: 1>} : vector<1x128xi32>
    %31 = vector.broadcast %29 : i32 to vector<1x128xi32>
    %32 = arith.addi %31, %30 : vector<1x128xi32>
    %c8_i32 = arith.constant 8 : i32
    %33 = vector.broadcast %c8_i32 : i32 to vector<1x128xi32>
    %34 = arith.cmpi slt, %32, %33 : vector<1x128xi32>
    %35 = arith.extui %34 : vector<1x128xi1> to vector<1x128xi32>
    %36 = arith.sitofp %35 : vector<1x128xi32> to vector<1x128xf32>
    %37 = vector.broadcast %36 : vector<1x128xf32> to vector<128x128xf32>
    %38 = arith.mulf %28, %37 : vector<128x128xf32>
    %cst_13 = arith.constant dense<0.000000e+00> : vector<128x128xf32>
    %39 = tpu.matmul %38, %4, %cst_13 {dimension_numbers = #tpu.dot_dimension_numbers<[0], [0], [1], [1], [0, 1, 1, 1], [], []>} : vector<128x128xf32>, vector<128x128xf32>, vector<128x128xf32> -> vector<128x128xf32>
    %c0_14 = arith.constant 0 : index
    %c0_15 = arith.constant 0 : index
    %40 = vector.load %arg6[%c0_14, %c0_15] : memref<128x128xf32, #tpu.memory_space<vmem>>, vector<128x128xf32>
    tpu.vector_store %arg6[%c0_14, %c0_15], %39 {strides = array<i32>} : memref<128x128xf32, #tpu.memory_space<vmem>>, vector<128x128xf32>,
    %c0_16 = arith.constant 0 : index
    %c0_17 = arith.constant 0 : index
    %41 = vector.load %arg7[%c0_16, %c0_17] : memref<128x128xf32, #tpu.memory_space<vmem>>, vector<128x128xf32>
    %cst_18 = arith.constant dense<0.000000e+00> : vector<128x128xf32>
    %42 = tpu.matmul %38, %3, %cst_18 {dimension_numbers = #tpu.dot_dimension_numbers<[1], [0], [0], [1], [0, 0, 1, 1], [], []>} : vector<128x128xf32>, vector<128x128xf32>, vector<128x128xf32> -> vector<128x128xf32>
    %43 = arith.addf %41, %42 : vector<128x128xf32>
    %c0_19 = arith.constant 0 : index
    %c0_20 = arith.constant 0 : index
    %44 = vector.load %arg7[%c0_19, %c0_20] : memref<128x128xf32, #tpu.memory_space<vmem>>, vector<128x128xf32>
    tpu.vector_store %arg7[%c0_19, %c0_20], %43 {strides = array<i32>} : memref<128x128xf32, #tpu.memory_space<vmem>>, vector<128x128xf32>,
    %c0_21 = arith.constant 0 : index
    %c0_22 = arith.constant 0 : index
    %45 = vector.load %arg8[%c0_21, %c0_22] : memref<128x1xf32, #tpu.memory_space<vmem>>, vector<128x1xf32>
    %cst_23 = arith.constant dense<0.000000e+00> : vector<128xf32>
    %46 = vector.multi_reduction <add>, %38, %cst_23 [1] : vector<128x128xf32> to vector<128xf32>
    %47 = vector.shape_cast %46 : vector<128xf32> to vector<128x1xf32>
    %48 = arith.addf %45, %47 : vector<128x1xf32>
    %c0_24 = arith.constant 0 : index
    %c0_25 = arith.constant 0 : index
    %49 = vector.load %arg8[%c0_24, %c0_25] : memref<128x1xf32, #tpu.memory_space<vmem>>, vector<128x1xf32>
    tpu.vector_store %arg8[%c0_24, %c0_25], %48 {strides = array<i32>} : memref<128x1xf32, #tpu.memory_space<vmem>>, vector<128x1xf32>,
    %50 = arith.subf %3, %39 : vector<128x128xf32>
    %c0_26 = arith.constant 0 : index
    %c0_27 = arith.constant 0 : index
    %51 = vector.load %arg9[%c0_26, %c0_27] : memref<1x1xf32, #tpu.memory_space<vmem>>, vector<1x1xf32>
    %52 = arith.mulf %50, %50 : vector<128x128xf32>
    %53 = vector.shape_cast %52 : vector<128x128xf32> to vector<1x128x128xf32>
    %cst_28 = arith.constant dense<0.000000e+00> : vector<1xf32>
    %54 = vector.multi_reduction <add>, %53, %cst_28 [1, 2] : vector<1x128x128xf32> to vector<1xf32>
    %55 = vector.shape_cast %54 : vector<1xf32> to vector<1x1x1xf32>
    %56 = vector.extract %55[0, 0, 0] : f32 from vector<1x1x1xf32>
    %57 = vector.broadcast %56 : f32 to vector<1x1xf32>
    %58 = arith.addf %51, %57 : vector<1x1xf32>
    %c0_29 = arith.constant 0 : index
    %c0_30 = arith.constant 0 : index
    %59 = vector.load %arg9[%c0_29, %c0_30] : memref<1x1xf32, #tpu.memory_space<vmem>>, vector<1x1xf32>
    tpu.vector_store %arg9[%c0_29, %c0_30], %58 {strides = array<i32>} : memref<1x1xf32, #tpu.memory_space<vmem>>, vector<1x1xf32>,
    %c0_i32_31 = arith.constant 0 : i32
    %60 = arith.cmpi eq, %arg0, %c0_i32_31 : i32
    %61 = arith.extui %60 : i1 to i32
    %c0_i32_32 = arith.constant 0 : i32
    %62 = arith.cmpi ne, %61, %c0_i32_32 : i32
    scf.if %62 {
      %c0_33 = arith.constant 0 : index
      %c0_34 = arith.constant 0 : index
      %63 = vector.load %arg2[%c0_33, %c0_34] : memref<128x128xf32, #tpu.memory_space<vmem>>, vector<128x128xf32>
      %cst_35 = arith.constant 9.900000e-01 : f32
      %64 = vector.broadcast %cst_35 : f32 to vector<128x128xf32>
      %65 = arith.mulf %64, %63 : vector<128x128xf32>
      %c0_36 = arith.constant 0 : index
      %c0_37 = arith.constant 0 : index
      %66 = vector.load %arg7[%c0_36, %c0_37] : memref<128x128xf32, #tpu.memory_space<vmem>>, vector<128x128xf32>
      %cst_38 = arith.constant 0.00999999977 : f32
      %67 = vector.broadcast %cst_38 : f32 to vector<128x128xf32>
      %68 = arith.mulf %67, %66 : vector<128x128xf32>
      %69 = arith.addf %65, %68 : vector<128x128xf32>
      %c0_39 = arith.constant 0 : index
      %c0_40 = arith.constant 0 : index
      %70 = vector.load %arg7[%c0_39, %c0_40] : memref<128x128xf32, #tpu.memory_space<vmem>>, vector<128x128xf32>
      tpu.vector_store %arg7[%c0_39, %c0_40], %69 {strides = array<i32>} : memref<128x128xf32, #tpu.memory_space<vmem>>, vector<128x128xf32>,
      %c0_41 = arith.constant 0 : index
      %c0_42 = arith.constant 0 : index
      %71 = vector.load %arg3[%c0_41, %c0_42] : memref<128x1xf32, #tpu.memory_space<vmem>>, vector<128x1xf32>
      %cst_43 = arith.constant 9.900000e-01 : f32
      %72 = vector.broadcast %cst_43 : f32 to vector<128x1xf32>
      %73 = arith.mulf %72, %71 : vector<128x1xf32>
      %c0_44 = arith.constant 0 : index
      %c0_45 = arith.constant 0 : index
      %74 = vector.load %arg8[%c0_44, %c0_45] : memref<128x1xf32, #tpu.memory_space<vmem>>, vector<128x1xf32>
      %cst_46 = arith.constant 0.00999999977 : f32
      %75 = vector.broadcast %cst_46 : f32 to vector<128x1xf32>
      %76 = arith.mulf %75, %74 : vector<128x1xf32>
      %77 = arith.addf %73, %76 : vector<128x1xf32>
      %c0_47 = arith.constant 0 : index
      %c0_48 = arith.constant 0 : index
      %78 = vector.load %arg8[%c0_47, %c0_48] : memref<128x1xf32, #tpu.memory_space<vmem>>, vector<128x1xf32>
      tpu.vector_store %arg8[%c0_47, %c0_48], %77 {strides = array<i32>} : memref<128x1xf32, #tpu.memory_space<vmem>>, vector<128x1xf32>,
      %c0_49 = arith.constant 0 : index
      %c0_50 = arith.constant 0 : index
      %79 = vector.load %arg9[%c0_49, %c0_50] : memref<1x1xf32, #tpu.memory_space<vmem>>, vector<1x1xf32>
      %cst_51 = arith.constant 3.906250e-03 : f32
      %80 = vector.broadcast %cst_51 : f32 to vector<1x1xf32>
      %81 = arith.mulf %79, %80 : vector<1x1xf32>
      %c0_52 = arith.constant 0 : index
      %c0_53 = arith.constant 0 : index
      %82 = vector.load %arg9[%c0_52, %c0_53] : memref<1x1xf32, #tpu.memory_space<vmem>>, vector<1x1xf32>
      tpu.vector_store %arg9[%c0_52, %c0_53], %81 {strides = array<i32>} : memref<1x1xf32, #tpu.memory_space<vmem>>, vector<1x1xf32>,
    } else {
    }
    return
  }
  func.func @transform_0(%arg0: i32) -> (i32, i32) {
    %c0_i32 = arith.constant 0 : i32
    %c0_i32_0 = arith.constant 0 : i32
    return %arg0, %c0_i32 : i32, i32
  }
  func.func @transform_1(%arg0: i32) -> (i32, i32) {
    %c0_i32 = arith.constant 0 : i32
    %c0_i32_0 = arith.constant 0 : i32
    %c0_i32_1 = arith.constant 0 : i32
    return %c0_i32, %c0_i32_0 : i32, i32
  }
  func.func @transform_2(%arg0: i32) -> (i32, i32) {
    %c0_i32 = arith.constant 0 : i32
    %c0_i32_0 = arith.constant 0 : i32
    %c0_i32_1 = arith.constant 0 : i32
    return %c0_i32, %c0_i32_0 : i32, i32
  }
  func.func @transform_3(%arg0: i32) -> (i32, i32) {
    %c0_i32 = arith.constant 0 : i32
    %c0_i32_0 = arith.constant 0 : i32
    %c0_i32_1 = arith.constant 0 : i32
    return %c0_i32, %c0_i32_0 : i32, i32
  }
  func.func @transform_4(%arg0: i32) -> (i32, i32) {
    %c0_i32 = arith.constant 0 : i32
    %c0_i32_0 = arith.constant 0 : i32
    return %c0_i32, %arg0 : i32, i32
  }
  func.func @transform_5(%arg0: i32) -> (i32, i32) {
    %c0_i32 = arith.constant 0 : i32
    %c0_i32_0 = arith.constant 0 : i32
    return %arg0, %c0_i32 : i32, i32
  }
  func.func @transform_6(%arg0: i32) -> (i32, i32) {
    %c0_i32 = arith.constant 0 : i32
    %c0_i32_0 = arith.constant 0 : i32
    %c0_i32_1 = arith.constant 0 : i32
    return %c0_i32, %c0_i32_0 : i32, i32
  }
  func.func @transform_7(%arg0: i32) -> (i32, i32) {
    %c0_i32 = arith.constant 0 : i32
    %c0_i32_0 = arith.constant 0 : i32
    %c0_i32_1 = arith.constant 0 : i32
    return %c0_i32, %c0_i32_0 : i32, i32
  }
  func.func @transform_8(%arg0: i32) -> (i32, i32) {
    %c0_i32 = arith.constant 0 : i32
    %c0_i32_0 = arith.constant 0 : i32
    %c0_i32_1 = arith.constant 0 : i32
    return %c0_i32, %c0_i32_0 : i32, i32
  }
}

</mosaic_0001>

<bundles_post_ra>
// kernel: tpu_custom_call.1
= control target key start
LH: loop header
LB: loop body
LE: loop exit
PB: predicated region body
PF: predicated region fallthrough
CT: control target
= control target key end

     0   :  { %14 = vsyncpa [#allocation4], 0  ;;  %s3290_s0 = inlined_call_operand.vmem [shape: f32[128,128], index: 0, kind: input, shape index: {}]   ;;  %s3291_s1 = inlined_call_operand.hbm [shape: f32[128,128], index: 1, kind: input, shape index: {}]   ;;  %s3292_s2 = inlined_call_operand.vmem [shape: f32[128,1], index: 2, kind: input, shape index: {}]   ;;  %s3293_s3 = inlined_call_operand.hbm [shape: f32[128,128], index: 3, kind: output, shape index: {0}]   ;;  %s3294_s4 = inlined_call_operand.hbm [shape: s32[1,128], index: 4, kind: output, shape index: {1}]   ;;  %s3295_s5 = inlined_call_operand.hbm [shape: f32[128,128], index: 5, kind: output, shape index: {2}]   ;;  %s3296_s6 = inlined_call_operand.hbm [shape: f32[128,128], index: 6, kind: output, shape index: {3}]   ;;  %s3297_s7 = inlined_call_operand.vmem [shape: f32[128,1], index: 7, kind: output, shape index: {4}]   ;;  %s3298_s8 = inlined_call_operand.hbm [shape: f32[1,1], index: 8, kind: output, shape index: {5}]  }
   0x1   :  { %15 = vsyncpa [#allocation5], 0 }
   0x2   :  { %16 = vsyncpa [#allocation8], 0 }
   0x3   :  { %17 = vsyncpa [#allocation11], 0  ;;  %s2241_s27 = smov [#allocation3]   ;;  %s2101_s9 = scalar_lea.hbm %s3291_s1, 2048 }
   0x4   :  { %s25_s28 = sshll.u32 %s2241_s27, 4  ;;  %p2102_p0 = scmp.ne.s32.totalorder %s3291_s1, %s2101_s9  ;;  %s26_s28 = int_to_ptr.vmem [resolvable:$true] %s25_s28 }
   0x5   :  { %p2105_p1 = scmp.lt.u32.totalorder %s2101_s9, %s3291_s1 }
   0x7   :  { %p2107_p2 = pnand %p2105_p1, %p2102_p0 }
   0x9   :  { %2110 = shalt.err (!%p2107_p2)
}
   0xa   :  { %s2111_s14 = scalar_lea.vmem %s26_s28, 2048  ;;  %p2116_p4 = scmp.lt.s32.totalorder %s26_s28, %s26_s28 }
   0xb   :  { %p2112_p3 = scmp.ne.s32.totalorder %s26_s28, %s2111_s14  ;;  %p2117_p5 = scmp.lt.s32.totalorder %s2111_s14, %s2111_s14 }
   0xd   :  { %p2118_p6 = por %p2117_p5, %p2116_p4 }
   0xf   :  { %p2119_p7 = pnand %p2118_p6, %p2112_p3 }
  0x11   :  { %2122 = shalt.err (!%p2119_p7)
}
  0x12   :  { %s2242_s15 = smov 128   ;;  %s2243_s16 = smov 8  }
  0x13   :  { %31 = dma.hbm_to_vmem [thread:$0]  %s3291_s1, 2048, %s26_s28, [#allocation4], %s2242_s15, %s2242_s15, %s2243_s16  }
  0x14   :  { %2233 = dma.done.wait [#allocation4], 2048  }
  0x15   :  { %2234 = vsyncadd [#allocation4], 4294965248  ;;  %v2244_v0 = vmov 0   ;;  %v2314_v1 = vld [vmem:[%s3292_s2] sm:$0xff]  ;;  %v2319_v2 = vld [vmem:[%s3292_s2 + $0x8] sm:$0xff]  ;;  %vm265_vm0 = vcmask 7168  }
  0x16   :  { %2043 = vset.pattern.permute.xlu0 %v2244_v0  ;;  %2044 = vset.pattern.permute.xlu1 %v2244_v0  ;;  %v316_v3 = vld [vmem:[%s3290_s0] sm:$0xff]  ;;  %2045 = vrcp.f32 %v2314_v1  ;;  %v317_v4 = vld [vmem:[%s3290_s0 + $0x8] sm:$0xff]  ;;  %v318_v5 = vld [vmem:[%s3290_s0 + $0x10] sm:$0xff]  ;;  %s2247_s30 = smov [#allocation10]  }
  0x17   :  { %v319_v6 = vld [vmem:[%s3290_s0 + $0x18] sm:$0xff]  ;;  %v2334_v7 = vpack.c.bf16 %v317_v4, %v316_v3  ;;  %2047 = vrcp.f32 %v2319_v2  ;;  %v320_v9 = vld [vmem:[%s3290_s0 + $0x20] sm:$0xff]  ;;  %v321_v10 = vld [vmem:[%s3290_s0 + $0x28] sm:$0xff]  ;;  %s1600_s9 = sshll.u32 %s2247_s30, 4  ;;  %s3086_s9 = int_to_ptr.vmem [resolvable:$true] %s1600_s9 }
  0x18   :  { %v2336_v8 = vpack.c.bf16 %v319_v6, %v318_v5  ;;  %v2348_v11 = vpack.c.bf16 %v321_v10, %v320_v9  ;;  %v322_v14 = vld [vmem:[%s3290_s0 + $0x30] sm:$0xff]  ;;  %v323_v15 = vld [vmem:[%s3290_s0 + $0x38] sm:$0xff]  ;;  %v324_v17 = vld [vmem:[%s3290_s0 + $0x40] sm:$0xff]  ;;  %v3299_v10 = vmov 0.0  }
  0x19   :  { %1936 = vmatprep.subr.bf16.mxu0 %v2334_v7  ;;  %v2358_v16 = vpack.c.bf16 %v323_v15, %v322_v14  ;;  %v325_v18 = vld [vmem:[%s3290_s0 + $0x48] sm:$0xff]  ;;  %v326_v20 = vld [vmem:[%s3290_s0 + $0x50] sm:$0xff]  ;;  %v327_v21 = vld [vmem:[%s3290_s0 + $0x58] sm:$0xff]  ;;  %298 = vst.msk [vmem:[%s3297_s7] sm:$0xff] %vm265_vm0, %v3299_v10 }
  0x1a   :  { %1938 = vmatpush3.bf16.xpose.msra.mxu0 %v2334_v7  ;;  %v2368_v19 = vpack.c.bf16 %v325_v18, %v324_v17  ;;  %v2378_v22 = vpack.c.bf16 %v327_v21, %v326_v20  ;;  %v328_v23 = vld [vmem:[%s3290_s0 + $0x60] sm:$0xff]  ;;  %v329_v24 = vld [vmem:[%s3290_s0 + $0x68] sm:$0xff]  ;;  %v330_v26 = vld [vmem:[%s3290_s0 + $0x70] sm:$0xff]  ;;  %299 = vst.msk [vmem:[%s3297_s7 + $0x8] sm:$0xff] %vm265_vm0, %v3299_v10 }
  0x1b   :  { %1940 = vmatprep.subr.bf16.mxu0 %v2336_v8  ;;  %v2388_v25 = vpack.c.bf16 %v329_v24, %v328_v23  ;;  %v331_v27 = vld [vmem:[%s3290_s0 + $0x78] sm:$0xff]  ;;  %v41_v29 = vld [vmem:[#allocation3] sm:$0xff]  ;;  %v42_v32 = vld [vmem:[#allocation3 + $0x8] sm:$0xff]  ;;  %300 = vst.msk [vmem:[%s3297_s7 + $0x10] sm:$0xff] %vm265_vm0, %v3299_v10 }
  0x1c   :  { %v2398_v28 = vpack.c.bf16 %v331_v27, %v330_v26  ;;  %v2406_v38 = vld [vmem:[%s3292_s2 + $0x10] sm:$0xff]  ;;  %v2412_v40 = vld [vmem:[%s3292_s2 + $0x18] sm:$0xff]  ;;  %v2425_v43 = vld [vmem:[%s3292_s2 + $0x20] sm:$0xff]  ;;  %301 = vst.msk [vmem:[%s3297_s7 + $0x18] sm:$0xff] %vm265_vm0, %v3299_v10 }
  0x1d   :  { %2049 = vrcp.f32 %v2406_v38  ;;  %v2418_v41 = vld [vmem:[%s3292_s2 + $0x30] sm:$0xff]  ;;  %v2431_v44 = vld [vmem:[%s3292_s2 + $0x40] sm:$0xff]  ;;  %v2438_v46 = vld [vmem:[%s3292_s2 + $0x28] sm:$0xff]  ;;  %302 = vst.msk [vmem:[%s3297_s7 + $0x20] sm:$0xff] %vm265_vm0, %v3299_v10 }
  0x1e   :  { %3308 = vst [vmem:[#allocation17_spill] sm:$0xff] %v2418_v41  ;;  %2051 = vrcp.f32 %v2412_v40  ;;  %3309 = vst [vmem:[#allocation18_spill] sm:$0xff] %v2431_v44  ;;  %v67_v47 = vld [vmem:[%s3292_s2 + $0x50] sm:$0xff]  ;;  %v2447_v50 = vld [vmem:[%s3292_s2 + $0x38] sm:$0xff] }
  0x1f   :  { %2053 = vrcp.f32 %v2418_v41  ;;  %3310 = vst [vmem:[#allocation19_spill] sm:$0xff] %v2447_v50  ;;  %v69_v52 = vld [vmem:[%s3292_s2 + $0x60] sm:$0xff]  ;;  %v66_v54 = vld [vmem:[%s3292_s2 + $0x48] sm:$0xff]  ;;  %v71_v56 = vld [vmem:[%s3292_s2 + $0x70] sm:$0xff] }
  0x20   :  { %v2046_v12 = vpop.eup %2045  ;;  %2055 = vrcp.f32 %v2425_v43  ;;  %v68_v59 = vld [vmem:[%s3292_s2 + $0x58] sm:$0xff]  ;;  %v70_v62 = vld [vmem:[%s3292_s2 + $0x68] sm:$0xff]  ;;  %303 = vst.msk [vmem:[%s3297_s7 + $0x28] sm:$0xff] %vm265_vm0, %v3299_v10  ;;  %304 = vst.msk [vmem:[%s3297_s7 + $0x30] sm:$0xff] %vm265_vm0, %v3299_v10 }
  0x21   :  { %107 = vperm.xlu0 %2043, %v2046_v12   ;;  %v2048_v13 = vpop.eup %2047  ;;  %2057 = vrcp.f32 %v2431_v44  ;;  %v72_v3 = vld [vmem:[%s3292_s2 + $0x78] sm:$0xff]  ;;  %305 = vst.msk [vmem:[%s3297_s7 + $0x38] sm:$0xff] %vm265_vm0, %v3299_v10  ;;  %306 = vst.msk [vmem:[%s3297_s7 + $0x40] sm:$0xff] %vm265_vm0, %v3299_v10  ;;  %v43_v15 = vld [vmem:[#allocation3 + $0x10] sm:$0xff] }
  0x22   :  { %1942 = vmatpush3.bf16.xpose.msra.mxu0 %v2336_v8  ;;  %2059 = vrcp.f32 %v2438_v46  ;;  %307 = vst.msk [vmem:[%s3297_s7 + $0x48] sm:$0xff] %vm265_vm0, %v3299_v10  ;;  %308 = vst.msk [vmem:[%s3297_s7 + $0x50] sm:$0xff] %vm265_vm0, %v3299_v10  ;;  %v2552_v27 = vld [vmem:[#allocation3 + $0x18] sm:$0xff]  ;;  %v53_v41 = vld [vmem:[#allocation3 + $0x60] sm:$0xff] }
  0x23   :  { %1944 = vmatprep.subr.bf16.mxu0 %v2348_v11  ;;  %2061 = vrcp.f32 %v67_v47  ;;  %309 = vst.msk [vmem:[%s3297_s7 + $0x58] sm:$0xff] %vm265_vm0, %v3299_v10  ;;  %310 = vst.msk [vmem:[%s3297_s7 + $0x60] sm:$0xff] %vm265_vm0, %v3299_v10 }
  0x24   :  { %2063 = vrcp.f32 %v2447_v50  ;;  %311 = vst.msk [vmem:[%s3297_s7 + $0x68] sm:$0xff] %vm265_vm0, %v3299_v10  ;;  %312 = vst.msk [vmem:[%s3297_s7 + $0x70] sm:$0xff] %vm265_vm0, %v3299_v10 }
  0x25   :  { %112 = vperm.xlu0 %2043, %v2048_v13   ;;  %2065 = vrcp.f32 %v69_v52  ;;  %313 = vst.msk [vmem:[%s3297_s7 + $0x78] sm:$0xff] %vm265_vm0, %v3299_v10  ;;  %3311 = vst [vmem:[#allocation20_spill] sm:$0xff] %v2552_v27 }
  0x26   :  { %2067 = vrcp.f32 %v66_v54  ;;  %v2570_v54 = vld [vmem:[#allocation3 + $0x28] sm:$0xff] }
  0x27   :  { %v2050_v48 = vpop.eup %2049  ;;  %2069 = vrcp.f32 %v71_v56  ;;  %3312 = vst [vmem:[#allocation21_spill] sm:$0xff] %v2570_v54 }
  0x28   :  { %v2052_v51 = vpop.eup %2051  ;;  %2071 = vrcp.f32 %v68_v59 }
  0x29   :  { %v2054_v53 = vpop.eup %2053  ;;  %2073 = vrcp.f32 %v70_v62 }
  0x2a   :  { %1946 = vmatpush3.bf16.xpose.msra.mxu0 %v2348_v11  ;;  %v2056_v55 = vpop.eup %2055  ;;  %2075 = vrcp.f32 %v72_v3 }
  0x2b   :  { %1948 = vmatprep.subr.bf16.mxu0 %v2358_v16  ;;  %v2058_v57 = vpop.eup %2057 }
  0x2c   :  { %v2060_v58 = vpop.eup %2059 }
  0x2d   :  { %v2062_v60 = vpop.eup %2061 }
  0x2e   :  { %v2064_v61 = vpop.eup %2063 }
  0x2f   :  { %v2066_v63 = vpop.eup %2065 }
  0x30   :  { %v2068_v0 = vpop.eup %2067 }
  0x31   :  { %v2070_v4 = vpop.eup %2069 }
  0x32   :  { %1950 = vmatpush3.bf16.xpose.msra.mxu0 %v2358_v16  ;;  %v2072_v5 = vpop.eup %2071 }
  0x33   :  { %1952 = vmatprep.subr.bf16.mxu0 %v2368_v19  ;;  %v2074_v6 = vpop.eup %2073 }
  0x34   :  { %v2076_v9 = vpop.eup %2075 }
  0x3a   :  { %1954 = vmatpush3.bf16.xpose.msra.mxu0 %v2368_v19 }
  0x3b   :  { %1956 = vmatprep.subr.bf16.mxu0 %v2378_v22 }
  0x42   :  { %1958 = vmatpush3.bf16.xpose.msra.mxu0 %v2378_v22 }
  0x43   :  { %1960 = vmatprep.subr.bf16.mxu0 %v2388_v25 }
  0x4a   :  { %1962 = vmatpush3.bf16.xpose.msra.mxu0 %v2388_v25 }
  0x4b   :  { %1964 = vmatprep.subr.bf16.mxu0 %v2398_v28 }
  0x52   :  { %1966 = vmatpush3.bf16.xpose.msra.mxu0 %v2398_v28 }
  0xa0   :  { %v108_v30 = vpop.permute.xlu0 %107 }
  0xa1   :  { %v185_v31 = vmul.f32 %v108_v30, %v41_v29  ;;  %v47_v29 = vld [vmem:[#allocation3 + $0x30] sm:$0xff] }
  0xa3   :  { %201 = vst [vmem:[#allocation6] sm:$0xff] %v185_v31  ;;  %v217_v33 = vmul.f32 %v185_v31, %v185_v31  ;;  %1799 = vmatprep.mubr.f32.mxu0 %v185_v31 }
  0xa4   :  { %v113_v34 = vpop.permute.xlu0 %112 }
  0xa5   :  { %v186_v35 = vmul.f32 %v113_v34, %v42_v32  ;;  %233 = vadd.xlane.f32.xlu1 %v217_v33 }
  0xa7   :  { %202 = vst [vmem:[#allocation6 + $0x8] sm:$0xff] %v186_v35  ;;  %v218_v36 = vmul.f32 %v186_v35, %v186_v35  ;;  %1800 = vmatmul.mubr.f32.vlgmr.msra.gmra.mrb[0].mxu0 %v186_v35  ;;  %v1967_v37 = vpack.c.bf16 %v186_v35, %v185_v31  ;;  %v3301_v31 = vlaneseq }
  0xa9   :  { %235 = vadd.xlane.f32.xlu1 %v218_v36  ;;  %1968 = vmatprep.subr.bf16.mxu1 %v1967_v37  ;;  %v2566_v47 = vshrl.u32 %v3301_v31, 7 }
  0xaa   :  { %1970 = vmatpush3.bf16.msra.mxu1 %v1967_v37  ;;  %v45_v37 = vld [vmem:[#allocation3 + $0x20] sm:$0xff] }
  0xab   :  { %v2580_v59 = vadd.s32 24, %v2566_v47 }
 0x132   :  { %v234_v39 = vpop.xlane.xlu1 %233 }
 0x133   :  { %266 = vst.msk [vmem:[#allocation2] sm:$0xff] %vm265_vm0, %v234_v39  ;;  %v49_v39 = vld [vmem:[#allocation3 + $0x40] sm:$0xff] }
 0x136   :  { %v236_v42 = vpop.xlane.xlu1 %235 }
 0x137   :  { %267 = vst.msk [vmem:[#allocation2 + $0x8] sm:$0xff] %vm265_vm0, %v236_v42 }
 0x13a   :  { %v493_v45 = vld [vmem:[#allocation2] sm:$0xff] }
 0x13b   :  { %527 = vperm.xlu0 %2043, %v493_v45  }
 0x13e   :  { %v494_v49 = vld [vmem:[#allocation2 + $0x8] sm:$0xff] }
 0x13f   :  { %117 = vperm.xlu0 %2043, %v2050_v48   ;;  %532 = vperm.xlu1 %2044, %v494_v49  }
 0x143   :  { %122 = vperm.xlu0 %2043, %v2052_v51   ;;  %137 = vperm.xlu1 %2044, %v2054_v53  }
 0x147   :  { %127 = vperm.xlu0 %2043, %v2056_v55   ;;  %147 = vperm.xlu1 %2044, %v2058_v57   ;;  %v51_v55 = vld [vmem:[#allocation3 + $0x50] sm:$0xff]  ;;  %v2574_v57 = vadd.s32 8, %v2566_v47 }
 0x14b   :  { %132 = vperm.xlu0 %2043, %v2060_v58   ;;  %157 = vperm.xlu1 %2044, %v2062_v60   ;;  %v2577_v58 = vadd.s32 16, %v2566_v47  ;;  %v2583_v60 = vadd.s32 32, %v2566_v47 }
 0x14f   :  { %142 = vperm.xlu0 %2043, %v2064_v61   ;;  %167 = vperm.xlu1 %2044, %v2066_v63   ;;  %v2586_v63 = vadd.s32 40, %v2566_v47 }
 0x153   :  { %152 = vperm.xlu0 %2043, %v2068_v0   ;;  %177 = vperm.xlu1 %2044, %v2070_v4  }
 0x157   :  { %162 = vperm.xlu0 %2043, %v2072_v5   ;;  %v2592_v5 = vadd.s32 48, %v2566_v47 }
 0x15b   :  { %172 = vperm.xlu0 %2043, %v2074_v6   ;;  %v2595_v6 = vadd.s32 56, %v2566_v47 }
 0x15f   :  { %182 = vperm.xlu0 %2043, %v2076_v9   ;;  %v2598_v9 = vadd.s32 64, %v2566_v47 }
 0x17a   :  { %v1801_v12 = vpop.f32.mrb[0].mxu0 }
 0x17b   :  { %v414_v13 = vpop.f32.mrb[1].mxu0  ;;  %v510_v17 = vmul.f32 2.0, %v1801_v12  ;;  %v2601_v12 = vadd.s32 72, %v2566_v47 }
 0x17c   :  { %v509_v18 = vmul.f32 2.0, %v414_v13  ;;  %v2603_v13 = vld [vmem:[#allocation3 + $0x38] sm:$0xff] }
 0x17d   :  { %3313 = vst [vmem:[#allocation22_spill] sm:$0xff] %v2603_v13 }
 0x1ba   :  { %v528_v14 = vpop.permute.xlu0 %527 }
 0x1bb   :  { %v2548_v23 = vsub.f32 %v528_v14, %v509_v18  ;;  %v2606_v14 = vadd.s32 80, %v2566_v47 }
 0x1be   :  { %v118_v20 = vpop.permute.xlu0 %117  ;;  %v533_v21 = vpop.permute.xlu1 %532 }
 0x1bf   :  { %v187_v24 = vmul.f32 %v118_v20, %v43_v15  ;;  %v2550_v26 = vsub.f32 %v533_v21, %v510_v17  ;;  %v2609_v15 = vadd.s32 88, %v2566_v47  ;;  %v2613_v20 = vadd.s32 96, %v2566_v47 }
 0x1c0   :  { %v2616_v21 = vadd.s32 104, %v2566_v47 }
 0x1c1   :  { %203 = vst [vmem:[#allocation6 + $0x10] sm:$0xff] %v187_v24  ;;  %v682_v30 = vmin.f32 %v2548_v23, %v2550_v26  ;;  %1802 = vmatprep.mubr.f32.mxu0 %v187_v24 }
 0x1c2   :  { %v123_v32 = vpop.permute.xlu0 %122  ;;  %v138_v33 = vpop.permute.xlu1 %137 }
 0x1c3   :  { %v685_v34 = vrot.slane %v682_v30, 4  ;;  %v2557_v35 = vmul.f32 %v123_v32, %v2552_v27  ;;  %v2559_v36 = vmul.f32 %v138_v33, %v47_v29  ;;  %v2622_v29 = vadd.s32 120, %v2566_v47 }
 0x1c5   :  { %v686_v42 = vmin.f32 %v682_v30, %v685_v34  ;;  %204 = vst [vmem:[#allocation6 + $0x18] sm:$0xff] %v2557_v35  ;;  %207 = vst [vmem:[#allocation6 + $0x30] sm:$0xff] %v2559_v36  ;;  %1803 = vmatmul.mubr.f32.gmra.mrb[2].mxu0 %v2557_v35  ;;  %v1971_v45 = vpack.c.bf16 %v2557_v35, %v187_v24  ;;  %v2619_v24 = vadd.s32 112, %v2566_v47 }
 0x1c6   :  { %v128_v48 = vpop.permute.xlu0 %127  ;;  %v148_v49 = vpop.permute.xlu1 %147 }
 0x1c7   :  { %v687_v51 = vrot.slane %v686_v42, 2  ;;  %v189_v52 = vmul.f32 %v128_v48, %v45_v37  ;;  %v2568_v53 = vmul.f32 %v148_v49, %v49_v39  ;;  %1972 = vmatprep.subr.bf16.mxu1 %v1971_v45 }
 0x1c8   :  { %1974 = vmatpush3.bf16.msra.mxu1 %v1971_v45 }
 0x1c9   :  { %v688_v56 = vmin.f32 %v686_v42, %v687_v51  ;;  %205 = vst [vmem:[#allocation6 + $0x20] sm:$0xff] %v189_v52  ;;  %209 = vst [vmem:[#allocation6 + $0x40] sm:$0xff] %v2568_v53  ;;  %1805 = vmatprep.mubr.f32.mxu0 %v189_v52 }
 0x1ca   :  { %v133_v61 = vpop.permute.xlu0 %132  ;;  %v158_v62 = vpop.permute.xlu1 %157 }
 0x1cb   :  { %v689_v0 = vrot.slane %v688_v56, 1  ;;  %v190_v3 = vmul.f32 %v133_v61, %v2570_v54  ;;  %v2589_v4 = vmul.f32 %v158_v62, %v51_v55 }
 0x1cd   :  { %v690_v17 = vmin.f32 %v688_v56, %v689_v0  ;;  %206 = vst [vmem:[#allocation6 + $0x28] sm:$0xff] %v190_v3  ;;  %211 = vst [vmem:[#allocation6 + $0x50] sm:$0xff] %v2589_v4  ;;  %1806 = vmatmul.mubr.f32.gmra.mrb[4].mxu0 %v190_v3  ;;  %v1975_v18 = vpack.c.bf16 %v190_v3, %v189_v52 }
 0x1ce   :  { %v143_v30 = vpop.permute.xlu0 %142  ;;  %1808 = vmatprep.mubr.f32.mxu0 %v2559_v36  ;;  %v168_v55 = vpop.permute.xlu1 %167 }
 0x1cf   :  { %vm691_vm1 = vcmp.le.f32.partialorder %v2548_v23, %v690_v17  ;;  %vm692_vm2 = vcmp.le.f32.partialorder %v2550_v26, %v690_v17  ;;  %vm1640_vm3 = vcmp.ge.f32.partialorder %v690_v17, inf  ;;  %v2628_v32 = vmul.f32 %v143_v30, %v2603_v13  ;;  %1976 = vmatprep.subr.bf16.mxu1 %v1975_v18  ;;  %v2663_v17 = vld [vmem:[#allocation3 + $0x48] sm:$0xff] }
 0x1d0   :  { %v707_v33 = vsel %vm691_vm1, %v2566_v47, 128  ;;  %v708_v34 = vsel %vm692_vm2, %v2574_v57, 128  ;;  %v709_v37 = vsel %vm1640_vm3, %v2577_v58, 128  ;;  %v710_v39 = vsel %vm1640_vm3, %v2580_v59, 128  ;;  %1978 = vmatpush3.bf16.msra.mxu1 %v1975_v18 }
 0x1d1   :  { %v711_v23 = vsel %vm1640_vm3, %v2583_v60, 128  ;;  %v712_v26 = vsel %vm1640_vm3, %v2586_v63, 128  ;;  %v713_v42 = vsel %vm1640_vm3, %v2592_v5, 128  ;;  %v714_v45 = vsel %vm1640_vm3, %v2595_v6, 128  ;;  %208 = vst [vmem:[#allocation6 + $0x38] sm:$0xff] %v2628_v32  ;;  %1809 = vmatmul.mubr.f32.gmra.mrb[6].mxu0 %v2628_v32 }
 0x1d2   :  { %v715_v48 = vsel %vm1640_vm3, %v2598_v9, 128  ;;  %v716_v49 = vsel %vm1640_vm3, %v2601_v12, 128  ;;  %v717_v51 = vsel %vm1640_vm3, %v2606_v14, 128  ;;  %v718_v52 = vsel %vm1640_vm3, %v2609_v15, 128  ;;  %v153_v56 = vpop.permute.xlu0 %152  ;;  %1811 = vmatprep.mubr.f32.mxu0 %v2568_v53 }
 0x1d3   :  { %v719_v61 = vsel %vm1640_vm3, %v2613_v20, 128  ;;  %v720_v62 = vsel %vm1640_vm3, %v2616_v21, 128  ;;  %v721_v0 = vsel %vm1640_vm3, %v2619_v24, 128  ;;  %v722_v3 = vsel %vm1640_vm3, %v2622_v29, 128 }
 0x1d4   :  { %vm723_vm4 = vcmp.lt.s32.totalorder %v707_v33, %v711_v23  ;;  %vm725_vm5 = vcmp.lt.s32.totalorder %v708_v34, %v712_v26  ;;  %vm727_vm6 = vcmp.lt.s32.totalorder %v709_v37, %v713_v42  ;;  %vm729_vm7 = vcmp.lt.s32.totalorder %v710_v39, %v714_v45 }
 0x1d5   :  { %v724_v18 = vsel %vm723_vm4, %v707_v33, %v711_v23  ;;  %v726_v30 = vsel %vm725_vm5, %v708_v34, %v712_v26  ;;  %v728_v10 = vsel %vm727_vm6, %v709_v37, %v713_v42  ;;  %v730_v31 = vsel %vm729_vm7, %v710_v39, %v714_v45  ;;  %v55_v33 = vld [vmem:[#allocation3 + $0x70] sm:$0xff]  ;;  %v178_v34 = vpop.permute.xlu1 %177  ;;  %v52_v37 = vld [vmem:[#allocation3 + $0x58] sm:$0xff]  ;;  %v54_v45 = vld [vmem:[#allocation3 + $0x68] sm:$0xff] }
 0x1d6   :  { %vm731_vm8 = vcmp.lt.s32.totalorder %v724_v18, %v715_v48  ;;  %vm733_vm9 = vcmp.lt.s32.totalorder %v726_v30, %v716_v49  ;;  %vm735_vm10 = vcmp.lt.s32.totalorder %v728_v10, %v717_v51  ;;  %vm737_vm11 = vcmp.lt.s32.totalorder %v730_v31, %v718_v52  ;;  %v163_v13 = vpop.permute.xlu0 %162 }
 0x1d7   :  { %v732_v54 = vsel %vm731_vm8, %v724_v18, %v715_v48  ;;  %v734_v27 = vsel %vm733_vm9, %v726_v30, %v716_v49  ;;  %v736_v44 = vsel %vm735_vm10, %v728_v10, %v717_v51  ;;  %v738_v50 = vsel %vm737_vm11, %v730_v31, %v718_v52 }
 0x1d8   :  { %vm739_vm12 = vcmp.lt.s32.totalorder %v732_v54, %v719_v61  ;;  %vm741_vm13 = vcmp.lt.s32.totalorder %v734_v27, %v720_v62  ;;  %vm743_vm14 = vcmp.lt.s32.totalorder %v736_v44, %v721_v0  ;;  %vm745_vm15 = vcmp.lt.s32.totalorder %v738_v50, %v722_v3 }
 0x1d9   :  { %v740_v39 = vsel %vm739_vm12, %v732_v54, %v719_v61  ;;  %v742_v23 = vsel %vm741_vm13, %v734_v27, %v720_v62  ;;  %v744_v26 = vsel %vm743_vm14, %v736_v44, %v721_v0  ;;  %v746_v42 = vsel %vm745_vm15, %v738_v50, %v722_v3  ;;  %v56_v27 = vld [vmem:[#allocation3 + $0x78] sm:$0xff] }
 0x1da   :  { %vm747_vm1 = vcmp.lt.s32.totalorder %v740_v39, %v742_v23  ;;  %vm749_vm2 = vcmp.lt.s32.totalorder %v744_v26, %v746_v42  ;;  %v2665_v48 = vmul.f32 %v168_v55, %v53_v41  ;;  %v2668_v10 = vmul.f32 %v153_v56, %v2663_v17  ;;  %v173_v31 = vpop.permute.xlu0 %172 }
 0x1db   :  { %v748_v49 = vsel %vm747_vm1, %v740_v39, %v742_v23  ;;  %v750_v51 = vsel %vm749_vm2, %v744_v26, %v746_v42  ;;  %v2670_v52 = vmul.f32 %v178_v34, %v55_v33  ;;  %v2672_v18 = vmul.f32 %v163_v13, %v52_v37 }
 0x1dc   :  { %vm751_vm3 = vcmp.lt.s32.totalorder %v748_v49, %v750_v51  ;;  %213 = vst [vmem:[#allocation6 + $0x60] sm:$0xff] %v2665_v48  ;;  %210 = vst [vmem:[#allocation6 + $0x48] sm:$0xff] %v2668_v10  ;;  %v1979_v44 = vpack.c.bf16 %v2628_v32, %v2559_v36  ;;  %v2678_v41 = vmul.f32 %v173_v31, %v54_v45  ;;  %1812 = vmatmul.mubr.f32.gmra.mrb[8].mxu0 %v2668_v10  ;;  %v3314_v61 = vlaneseq }
 0x1dd   :  { %v1983_v50 = vpack.c.bf16 %v2668_v10, %v2568_v53  ;;  %v752_v54 = vsel %vm751_vm3, %v748_v49, %v750_v51  ;;  %215 = vst [vmem:[#allocation6 + $0x70] sm:$0xff] %v2670_v52  ;;  %212 = vst [vmem:[#allocation6 + $0x58] sm:$0xff] %v2672_v18  ;;  %1814 = vmatprep.mubr.f32.mxu0 %v2589_v4  ;;  %v1987_v53 = vpack.c.bf16 %v2672_v18, %v2589_v4  ;;  %v3315_v34 = vmov 0.0  }
 0x1de   :  { %v753_v13 = vrot.slane %v752_v54, 4  ;;  %214 = vst [vmem:[#allocation6 + $0x68] sm:$0xff] %v2678_v41  ;;  %1980 = vmatprep.subr.bf16.mxu1 %v1979_v44  ;;  %v183_v36 = vpop.permute.xlu0 %182  ;;  %v813_v62 = vand.u32 127, %v3314_v61  ;;  %v1991_v0 = vpack.c.bf16 %v2678_v41, %v2665_v48 }
 0x1df   :  { %1982 = vmatpush3.bf16.msra.mxu1 %v1979_v44  ;;  %v2687_v32 = vmul.f32 %v183_v36, %v56_v27 }
 0x1e0   :  { %vm754_vm4 = vcmp.lt.s32.totalorder %v752_v54, %v753_v13  ;;  %1984 = vmatprep.subr.bf16.mxu1 %v1983_v50  ;;  %1815 = vmatmul.mubr.f32.gmra.mrb[10].mxu0 %v2672_v18  ;;  %vm816_vm6 = vcmp.lt.s32.totalorder %v813_v62, 8  ;;  %v231_v62 = vmul.f32 %v2670_v52, %v2670_v52 }
 0x1e1   :  { %v755_v55 = vsel %vm754_vm4, %v752_v54, %v753_v13  ;;  %216 = vst [vmem:[#allocation6 + $0x78] sm:$0xff] %v2687_v32  ;;  %1817 = vmatprep.mubr.f32.mxu0 %v2665_v48  ;;  %v1995_v30 = vpack.c.bf16 %v2687_v32, %v2670_v52  ;;  %v2705_v37 = vsel %vm816_vm6, 1.0, %v3315_v34 }
 0x1e2   :  { %v756_v56 = vrot.slane %v755_v55, 2 }
 0x1e3   :  { %1986 = vmatpush3.bf16.msra.mxu1 %v1983_v50 }
 0x1e4   :  { %vm757_vm5 = vcmp.lt.s32.totalorder %v755_v55, %v756_v56  ;;  %1988 = vmatprep.subr.bf16.mxu1 %v1987_v53  ;;  %1818 = vmatmul.mubr.f32.gmra.mrb[12].mxu0 %v2678_v41 }
 0x1e5   :  { %v758_v3 = vsel %vm757_vm5, %v755_v55, %v756_v56  ;;  %1820 = vmatprep.mubr.f32.mxu0 %v2670_v52 }
 0x1e6   :  { %v759_v4 = vrot.slane %v758_v3, 1 }
 0x1e7   :  { %1990 = vmatpush3.bf16.msra.mxu1 %v1987_v53 }
 0x1e8   :  { %vm760_vm7 = vcmp.lt.s32.totalorder %v758_v3, %v759_v4  ;;  %1992 = vmatprep.subr.bf16.mxu1 %v1991_v0  ;;  %1821 = vmatmul.mubr.f32.gmra.mrb[14].mxu0 %v2687_v32 }
 0x1e9   :  { %v2702_v33 = vsel %vm760_vm7, %v758_v3, %v759_v4 }
 0x1ea   :  { %762 = vst [vmem:[#allocation7] sm:$0x1] %v2702_v33  ;;  %vm763_vm8 = vcmp.eq.s32.totalorder %v2566_v47, %v2702_v33  ;;  %vm764_vm9 = vcmp.eq.s32.totalorder %v2574_v57, %v2702_v33  ;;  %vm765_vm10 = vcmp.eq.s32.totalorder %v2577_v58, %v2702_v33  ;;  %vm774_vm11 = vcmp.eq.s32.totalorder %v2609_v15, %v2702_v33 }
 0x1eb   :  { %1994 = vmatpush3.bf16.msra.mxu1 %v1991_v0  ;;  %v1654_v39 = vsel %vm763_vm8, 1.0, %v3315_v34  ;;  %v1655_v26 = vsel %vm764_vm9, 1.0, %v3315_v34  ;;  %v1656_v57 = vsel %vm765_vm10, 1.0, %v3315_v34  ;;  %vm766_vm12 = vcmp.eq.s32.totalorder %v2580_v59, %v2702_v33 }
 0x1ec   :  { %1996 = vmatprep.subr.bf16.mxu1 %v1995_v30  ;;  %v2714_v23 = vmul.f32 %v2705_v37, %v1654_v39  ;;  %v2722_v47 = vmul.f32 %v2705_v37, %v1655_v26  ;;  %vm775_vm13 = vcmp.eq.s32.totalorder %v2613_v20, %v2702_v33  ;;  %vm776_vm14 = vcmp.eq.s32.totalorder %v2616_v21, %v2702_v33 }
 0x1ed   :  { %vm777_vm15 = vcmp.eq.s32.totalorder %v2619_v24, %v2702_v33  ;;  %v2739_v58 = vmul.f32 %v2705_v37, %v1656_v57  ;;  %vm778_vm1 = vcmp.eq.s32.totalorder %v2622_v29, %v2702_v33  ;;  %v1657_v42 = vsel %vm766_vm12, 1.0, %v3315_v34 }
 0x1ee   :  { %1237 = vadd.xlane.f32.xlu0 %v2714_v23  ;;  %835 = vxpose.xlu1.b32.start [1/16] %v2714_v23, 128  ;;  %vm767_vm2 = vcmp.eq.s32.totalorder %v2583_v60, %v2702_v33  ;;  %v2749_v59 = vmul.f32 %v2705_v37, %v1657_v42  ;;  %vm768_vm3 = vcmp.eq.s32.totalorder %v2586_v63, %v2702_v33  ;;  %v1665_v13 = vsel %vm774_vm11, 1.0, %v3315_v34 }
 0x1ef   :  { %1998 = vmatpush3.bf16.msra.mxu1 %v1995_v30  ;;  %v1658_v45 = vsel %vm767_vm2, 1.0, %v3315_v34  ;;  %v1659_v49 = vsel %vm768_vm3, 1.0, %v3315_v34  ;;  %vm769_vm4 = vcmp.eq.s32.totalorder %v2592_v5, %v2702_v33  ;;  %vm770_vm5 = vcmp.eq.s32.totalorder %v2595_v6, %v2702_v33 }
 0x1f0   :  { %2000 = vmatprep.subr.bf16.mxu1 %v2334_v7  ;;  %v2757_v31 = vmul.f32 %v2705_v37, %v1658_v45  ;;  %v2765_v60 = vmul.f32 %v2705_v37, %v1659_v49  ;;  %v1660_v51 = vsel %vm769_vm4, 1.0, %v3315_v34  ;;  %v1661_v44 = vsel %vm770_vm5, 1.0, %v3315_v34  ;;  %v1224_v45 = vld [vmem:[%s3297_s7 + $0x18] sm:$0xff] }
 0x1f1   :  { %v2773_v63 = vmul.f32 %v2705_v37, %v1660_v51  ;;  %vm771_vm6 = vcmp.eq.s32.totalorder %v2598_v9, %v2702_v33  ;;  %v2781_v5 = vmul.f32 %v2705_v37, %v1661_v44  ;;  %vm772_vm7 = vcmp.eq.s32.totalorder %v2601_v12, %v2702_v33 }
 0x1f2   :  { %1239 = vadd.xlane.f32.xlu0 %v2722_v47  ;;  %836 = vxpose.xlu1.b32.cont [2/16] %v2722_v47, 128  ;;  %v1662_v50 = vsel %vm771_vm6, 1.0, %v3315_v34  ;;  %v1663_v27 = vsel %vm772_vm7, 1.0, %v3315_v34  ;;  %vm773_vm8 = vcmp.eq.s32.totalorder %v2606_v14, %v2702_v33  ;;  %v2810_v36 = vmul.f32 %v2705_v37, %v1665_v13 }
 0x1f3   :  { %v2789_v6 = vmul.f32 %v2705_v37, %v1662_v50  ;;  %v2797_v9 = vmul.f32 %v2705_v37, %v1663_v27  ;;  %v1664_v54 = vsel %vm773_vm8, 1.0, %v3315_v34  ;;  %v1666_v14 = vsel %vm775_vm13, 1.0, %v3315_v34 }
 0x1f4   :  { %v2802_v12 = vmul.f32 %v2705_v37, %v1664_v54  ;;  %v2818_v53 = vmul.f32 %v2705_v37, %v1666_v14  ;;  %v1667_v15 = vsel %vm776_vm14, 1.0, %v3315_v34  ;;  %v1668_v20 = vsel %vm777_vm15, 1.0, %v3315_v34  ;;  %v1225_v54 = vld [vmem:[%s3297_s7 + $0x20] sm:$0xff] }
 0x1f5   :  { %v2826_v55 = vmul.f32 %v2705_v37, %v1667_v15  ;;  %v2834_v56 = vmul.f32 %v2705_v37, %v1668_v20  ;;  %v1669_v21 = vsel %vm778_vm1, 1.0, %v3315_v34  ;;  %v220_v24 = vmul.f32 %v2557_v35, %v2557_v35  ;;  %v1221_v35 = vld [vmem:[%s3297_s7] sm:$0xff] }
 0x1f6   :  { %1241 = vadd.xlane.f32.xlu0 %v2739_v58  ;;  %837 = vxpose.xlu1.b32.cont [3/16] %v2739_v58, 128  ;;  %v2842_v61 = vmul.f32 %v2705_v37, %v1669_v21  ;;  %v1478_v57 = vmul.f32 0.99, %v2314_v1  ;;  %v1479_v44 = vmul.f32 0.99, %v2319_v2  ;;  %v1480_v15 = vmul.f32 0.99, %v2406_v38 }
 0x1f7   :  { %vm314_vm9 = vcmask 0  }
 0x1f8   :  { %315 = vst.msk [vmem:[#allocation12] sm:$0x1] %vm314_vm9, %v3315_v34 }
 0x1fa   :  { %1243 = vadd.xlane.f32.xlu0 %v2749_v59  ;;  %838 = vxpose.xlu1.b32.cont [4/16] %v2749_v59, 128 }
 0x1fe   :  { %1245 = vadd.xlane.f32.xlu0 %v2757_v31  ;;  %839 = vxpose.xlu1.b32.cont [5/16] %v2757_v31, 128 }
 0x202   :  { %1247 = vadd.xlane.f32.xlu0 %v2765_v60  ;;  %840 = vxpose.xlu1.b32.cont [6/16] %v2765_v60, 128 }
 0x206   :  { %1249 = vadd.xlane.f32.xlu0 %v2773_v63  ;;  %841 = vxpose.xlu1.b32.cont [7/16] %v2773_v63, 128 }
 0x20a   :  { %1251 = vadd.xlane.f32.xlu0 %v2781_v5  ;;  %842 = vxpose.xlu1.b32.cont [8/16] %v2781_v5, 128 }
 0x20e   :  { %1253 = vadd.xlane.f32.xlu0 %v2789_v6  ;;  %843 = vxpose.xlu1.b32.cont [9/16] %v2789_v6, 128 }
 0x212   :  { %844 = vxpose.xlu1.b32.cont [10/16] %v2797_v9, 128 }
 0x216   :  { %845 = vxpose.xlu1.b32.cont [11/16] %v2802_v12, 128 }
 0x21a   :  { %846 = vxpose.xlu1.b32.cont [12/16] %v2810_v36, 128 }
 0x21e   :  { %847 = vxpose.xlu1.b32.cont [13/16] %v2818_v53, 128 }
 0x222   :  { %848 = vxpose.xlu1.b32.cont [14/16] %v2826_v55, 128 }
 0x226   :  { %849 = vxpose.xlu1.b32.cont [15/16] %v2834_v56, 128 }
 0x22a   :  { %850 = vxpose.xlu1.b32.end [16/16] %v2842_v61, 128 }
 0x251   :  { %239 = vadd.xlane.f32.xlu1 %v220_v24  ;;  %v1226_v24 = vld [vmem:[%s3297_s7 + $0x28] sm:$0xff] }
 0x255   :  { %261 = vadd.xlane.f32.xlu1 %v231_v62 }
 0x26e   :  { %v851_v0 = vpop.trf.xlu1 }
 0x26f   :  { %1855 = vmatprep.mubr.f32.mxu1 %v851_v0 }
 0x272   :  { %v852_v3 = vpop.trf.xlu1 }
 0x273   :  { %1856 = vmatmul.mubr.f32.vlgmr.msra.gmra.mrb[0].mxu1 %v852_v3  ;;  %v1481_v3 = vmul.f32 0.99, %v2412_v40 }
 0x274   :  { %2002 = vmatpush3.bf16.msra.mxu1 %v2334_v7  ;;  %v1222_v7 = vld [vmem:[%s3297_s7 + $0x8] sm:$0xff] }
 0x275   :  { %2004 = vmatprep.subr.bf16.mxu1 %v2336_v8 }
 0x276   :  { %v853_v29 = vpop.trf.xlu1 }
 0x277   :  { %1858 = vmatprep.mubr.f32.mxu1 %v853_v29 }
 0x278   :  { %2006 = vmatpush3.bf16.msra.mxu1 %v2336_v8 }
 0x279   :  { %2008 = vmatprep.subr.bf16.mxu1 %v2348_v11 }
 0x27a   :  { %v854_v52 = vpop.trf.xlu1 }
 0x27b   :  { %v1238_v4 = vpop.xlane.xlu0 %1237  ;;  %1859 = vmatmul.mubr.f32.gmra.mrb[2].mxu1 %v854_v52  ;;  %v1227_v52 = vld [vmem:[%s3297_s7 + $0x30] sm:$0xff] }
 0x27c   :  { %v1269_v30 = vadd.f32 %v1238_v4, %v1221_v35  ;;  %2010 = vmatpush3.bf16.msra.mxu1 %v2348_v11  ;;  %v1223_v11 = vld [vmem:[%s3297_s7 + $0x10] sm:$0xff] }
 0x27d   :  { %2012 = vmatprep.subr.bf16.mxu1 %v2358_v16 }
 0x27e   :  { %1286 = vst.msk [vmem:[%s3297_s7] sm:$0xff] %vm265_vm0, %v1269_v30  ;;  %v855_v8 = vpop.trf.xlu1 }
 0x27f   :  { %v1240_v33 = vpop.xlane.xlu0 %1239  ;;  %1861 = vmatprep.mubr.f32.mxu1 %v855_v8 }
 0x280   :  { %v1270_v37 = vadd.f32 %v1240_v33, %v1222_v7  ;;  %2014 = vmatpush3.bf16.msra.mxu1 %v2358_v16  ;;  %v1482_v7 = vmul.f32 0.99, %v2425_v43 }
 0x281   :  { %2016 = vmatprep.subr.bf16.mxu1 %v2368_v19 }
 0x282   :  { %1287 = vst.msk [vmem:[%s3297_s7 + $0x8] sm:$0xff] %vm265_vm0, %v1270_v37  ;;  %v856_v39 = vpop.trf.xlu1  ;;  %v1228_v37 = vld [vmem:[%s3297_s7 + $0x38] sm:$0xff] }
 0x283   :  { %v1242_v26 = vpop.xlane.xlu0 %1241  ;;  %1862 = vmatmul.mubr.f32.gmra.mrb[4].mxu1 %v856_v39 }
 0x284   :  { %v1271_v42 = vadd.f32 %v1242_v26, %v1223_v11  ;;  %2018 = vmatpush3.bf16.msra.mxu1 %v2368_v19 }
 0x285   :  { %v1494_v16 = vld [vmem:[%s3297_s7] sm:$0xff]  ;;  %2020 = vmatprep.subr.bf16.mxu1 %v2378_v22 }
 0x286   :  { %v1510_v49 = vmul.f32 0.01, %v1494_v16  ;;  %1288 = vst.msk [vmem:[%s3297_s7 + $0x10] sm:$0xff] %vm265_vm0, %v1271_v42  ;;  %v857_v1 = vpop.trf.xlu1 }
 0x287   :  { %v1244_v51 = vpop.xlane.xlu0 %1243  ;;  %1864 = vmatprep.mubr.f32.mxu1 %v857_v1 }
 0x288   :  { %v1526_v19 = vadd.f32 %v1510_v49, %v1478_v57  ;;  %v1272_v50 = vadd.f32 %v1244_v51, %v1224_v45  ;;  %2022 = vmatpush3.bf16.msra.mxu1 %v2378_v22  ;;  %v1483_v57 = vmul.f32 0.99, %v2438_v46  ;;  %v1229_v49 = vld [vmem:[%s3297_s7 + $0x40] sm:$0xff] }
 0x289   :  { %v1495_v27 = vld [vmem:[%s3297_s7 + $0x8] sm:$0xff]  ;;  %2024 = vmatprep.subr.bf16.mxu1 %v2388_v25 }
 0x28a   :  { %1542 = vst.msk [vmem:[%s3297_s7] sm:$0xff] %vm265_vm0, %v1526_v19  ;;  %v1511_v13 = vmul.f32 0.01, %v1495_v27  ;;  %1289 = vst.msk [vmem:[%s3297_s7 + $0x18] sm:$0xff] %vm265_vm0, %v1272_v50  ;;  %v858_v2 = vpop.trf.xlu1  ;;  %v3316_v50 = vld [vmem:[#allocation17_spill] sm:$0xff] }
 0x28b   :  { %v1246_v22 = vpop.xlane.xlu0 %1245  ;;  %1865 = vmatmul.mubr.f32.gmra.mrb[6].mxu1 %v858_v2  ;;  %v1484_v27 = vmul.f32 0.99, %v3316_v50 }
 0x28c   :  { %v1527_v14 = vadd.f32 %v1511_v13, %v1479_v44  ;;  %v1273_v20 = vadd.f32 %v1246_v22, %v1225_v54  ;;  %2026 = vmatpush3.bf16.msra.mxu1 %v2388_v25 }
 0x28d   :  { %v1496_v21 = vld [vmem:[%s3297_s7 + $0x10] sm:$0xff]  ;;  %2028 = vmatprep.subr.bf16.mxu1 %v2398_v28 }
 0x28e   :  { %1543 = vst.msk [vmem:[%s3297_s7 + $0x8] sm:$0xff] %vm265_vm0, %v1527_v14  ;;  %v1512_v62 = vmul.f32 0.01, %v1496_v21  ;;  %1290 = vst.msk [vmem:[%s3297_s7 + $0x20] sm:$0xff] %vm265_vm0, %v1273_v20  ;;  %v859_v25 = vpop.trf.xlu1 }
 0x28f   :  { %v1248_v38 = vpop.xlane.xlu0 %1247  ;;  %1867 = vmatprep.mubr.f32.mxu1 %v859_v25 }
 0x290   :  { %v1528_v0 = vadd.f32 %v1512_v62, %v1480_v15  ;;  %v1274_v29 = vadd.f32 %v1248_v38, %v1226_v24  ;;  %2030 = vmatpush3.bf16.msra.mxu1 %v2398_v28  ;;  %v3317_v15 = vld [vmem:[#allocation19_spill] sm:$0xff] }
 0x291   :  { %v1497_v35 = vld [vmem:[%s3297_s7 + $0x18] sm:$0xff]  ;;  %v1485_v20 = vmul.f32 0.99, %v3317_v15  ;;  %v2082_v15 = vld [vmem:[%s3290_s0 + $0x20] sm:$0xff] }
 0x292   :  { %1544 = vst.msk [vmem:[%s3297_s7 + $0x10] sm:$0xff] %vm265_vm0, %v1528_v0  ;;  %v1513_v4 = vmul.f32 0.01, %v1497_v35  ;;  %1291 = vst.msk [vmem:[%s3297_s7 + $0x28] sm:$0xff] %vm265_vm0, %v1274_v29  ;;  %v860_v28 = vpop.trf.xlu1 }
 0x293   :  { %v1250_v40 = vpop.xlane.xlu0 %1249  ;;  %1868 = vmatmul.mubr.f32.gmra.mrb[8].mxu1 %v860_v28 }
 0x294   :  { %v1529_v30 = vadd.f32 %v1513_v4, %v1481_v3  ;;  %v1275_v8 = vadd.f32 %v1250_v40, %v1227_v52  ;;  %v3318_v3 = vld [vmem:[#allocation18_spill] sm:$0xff] }
 0x295   :  { %v1498_v33 = vld [vmem:[%s3297_s7 + $0x20] sm:$0xff]  ;;  %v1486_v29 = vmul.f32 0.99, %v3318_v3  ;;  %v2083_v3 = vld [vmem:[%s3290_s0 + $0x38] sm:$0xff] }
 0x296   :  { %1545 = vst.msk [vmem:[%s3297_s7 + $0x18] sm:$0xff] %vm265_vm0, %v1529_v30  ;;  %v1514_v11 = vmul.f32 0.01, %v1498_v33  ;;  %1292 = vst.msk [vmem:[%s3297_s7 + $0x30] sm:$0xff] %vm265_vm0, %v1275_v8  ;;  %v861_v43 = vpop.trf.xlu1 }
 0x297   :  { %v1252_v39 = vpop.xlane.xlu0 %1251  ;;  %1870 = vmatprep.mubr.f32.mxu1 %v861_v43 }
 0x298   :  { %v1530_v26 = vadd.f32 %v1514_v11, %v1482_v7  ;;  %v1276_v42 = vadd.f32 %v1252_v39, %v1228_v37  ;;  %v1804_v16 = vpop.f32.mrb[2].mxu0 }
 0x299   :  { %v1499_v45 = vld [vmem:[%s3297_s7 + $0x28] sm:$0xff]  ;;  %v424_v1 = vpop.f32.mrb[3].mxu0 }
 0x29a   :  { %1546 = vst.msk [vmem:[%s3297_s7 + $0x20] sm:$0xff] %vm265_vm0, %v1530_v26  ;;  %v1515_v51 = vmul.f32 0.01, %v1499_v45  ;;  %1293 = vst.msk [vmem:[%s3297_s7 + $0x38] sm:$0xff] %vm265_vm0, %v1276_v42  ;;  %v862_v46 = vpop.trf.xlu1  ;;  %v2079_v1 = vld [vmem:[%s3290_s0 + $0x18] sm:$0xff] }
 0x29b   :  { %v1254_v19 = vpop.xlane.xlu0 %1253  ;;  %1871 = vmatmul.mubr.f32.gmra.mrb[10].mxu1 %v862_v46  ;;  %v2080_v46 = vld [vmem:[%s3290_s0 + $0x10] sm:$0xff] }
 0x29c   :  { %v1531_v44 = vadd.f32 %v1515_v51, %v1483_v57  ;;  %v1277_v54 = vadd.f32 %v1254_v19, %v1229_v49 }
 0x29d   :  { %v1500_v13 = vld [vmem:[%s3297_s7 + $0x30] sm:$0xff] }
 0x29e   :  { %1547 = vst.msk [vmem:[%s3297_s7 + $0x28] sm:$0xff] %vm265_vm0, %v1531_v44  ;;  %v1516_v2 = vmul.f32 0.01, %v1500_v13  ;;  %1294 = vst.msk [vmem:[%s3297_s7 + $0x40] sm:$0xff] %vm265_vm0, %v1277_v54  ;;  %v863_v22 = vpop.trf.xlu1 }
 0x29f   :  { %1873 = vmatprep.mubr.f32.mxu1 %v863_v22  ;;  %v2081_v22 = vld [vmem:[%s3290_s0 + $0x28] sm:$0xff] }
 0x2a0   :  { %v1532_v14 = vadd.f32 %v1516_v2, %v1484_v27  ;;  %v1807_v21 = vpop.f32.mrb[4].mxu0 }
 0x2a1   :  { %v1501_v24 = vld [vmem:[%s3297_s7 + $0x38] sm:$0xff]  ;;  %v434_v62 = vpop.f32.mrb[5].mxu0 }
 0x2a2   :  { %1548 = vst.msk [vmem:[%s3297_s7 + $0x30] sm:$0xff] %vm265_vm0, %v1532_v14  ;;  %v1517_v25 = vmul.f32 0.01, %v1501_v24  ;;  %v864_v38 = vpop.trf.xlu1 }
 0x2a3   :  { %1874 = vmatmul.mubr.f32.gmra.mrb[12].mxu1 %v864_v38 }
 0x2a4   :  { %v1533_v0 = vadd.f32 %v1517_v25, %v1485_v20  ;;  %v1810_v35 = vpop.f32.mrb[6].mxu0 }
 0x2a5   :  { %v1502_v52 = vld [vmem:[%s3297_s7 + $0x40] sm:$0xff]  ;;  %v444_v4 = vpop.f32.mrb[7].mxu0  ;;  %v2084_v35 = vld [vmem:[%s3290_s0 + $0x30] sm:$0xff] }
 0x2a6   :  { %1549 = vst.msk [vmem:[%s3297_s7 + $0x38] sm:$0xff] %vm265_vm0, %v1533_v0  ;;  %v1518_v28 = vmul.f32 0.01, %v1502_v52  ;;  %v865_v40 = vpop.trf.xlu1 }
 0x2a7   :  { %1876 = vmatprep.mubr.f32.mxu1 %v865_v40 }
 0x2a8   :  { %v1534_v30 = vadd.f32 %v1518_v28, %v1486_v29 }
 0x2aa   :  { %1550 = vst.msk [vmem:[%s3297_s7 + $0x40] sm:$0xff] %vm265_vm0, %v1534_v30  ;;  %v866_v7 = vpop.trf.xlu1 }
 0x2ab   :  { %1877 = vmatmul.mubr.f32.gmra.mrb[14].mxu1 %v866_v7 }
 0x2ac   :  { %1911 = vmatprep.mubr.f32.mxu1 %v2714_v23 }
 0x2af   :  { %1912 = vmatmul.mubr.f32.vlgmr.msra.gmra.mrb[16].mxu1 %v2722_v47  ;;  %v1813_v8 = vpop.f32.mrb[8].mxu0 }
 0x2b0   :  { %1914 = vmatprep.mubr.f32.mxu1 %v2739_v58  ;;  %v454_v33 = vpop.f32.mrb[9].mxu0 }
 0x2b1   :  { %v2085_v33 = vld [vmem:[%s3290_s0 + $0x48] sm:$0xff] }
 0x2b3   :  { %1915 = vmatmul.mubr.f32.gmra.mrb[18].mxu1 %v2749_v59  ;;  %v1816_v37 = vpop.f32.mrb[10].mxu0 }
 0x2b4   :  { %1917 = vmatprep.mubr.f32.mxu1 %v2757_v31  ;;  %v464_v11 = vpop.f32.mrb[11].mxu0 }
 0x2b5   :  { %v2086_v11 = vld [vmem:[%s3290_s0 + $0x40] sm:$0xff] }
 0x2b7   :  { %1918 = vmatmul.mubr.f32.gmra.mrb[20].mxu1 %v2765_v60  ;;  %v1819_v43 = vpop.f32.mrb[12].mxu0  ;;  %v2077_v60 = vld [vmem:[%s3290_s0 + $0x8] sm:$0xff] }
 0x2b8   :  { %1920 = vmatprep.mubr.f32.mxu1 %v2773_v63  ;;  %v474_v39 = vpop.f32.mrb[13].mxu0 }
 0x2bb   :  { %1921 = vmatmul.mubr.f32.gmra.mrb[22].mxu1 %v2781_v5  ;;  %v1822_v23 = vpop.f32.mrb[14].mxu0 }
 0x2bc   :  { %1923 = vmatprep.mubr.f32.mxu1 %v2789_v6  ;;  %v484_v47 = vpop.f32.mrb[15].mxu0  ;;  %v2078_v6 = vld [vmem:[%s3290_s0] sm:$0xff] }
 0x2bf   :  { %1924 = vmatmul.mubr.f32.gmra.mrb[24].mxu1 %v2797_v9 }
 0x2c0   :  { %1926 = vmatprep.mubr.f32.mxu1 %v2802_v12 }
 0x2c3   :  { %1927 = vmatmul.mubr.f32.gmra.mrb[26].mxu1 %v2810_v36 }
 0x2c4   :  { %1929 = vmatprep.mubr.f32.mxu1 %v2818_v53 }
 0x2c7   :  { %1930 = vmatmul.mubr.f32.gmra.mrb[28].mxu1 %v2826_v55 }
 0x2c8   :  { %1932 = vmatprep.mubr.f32.mxu1 %v2834_v56 }
 0x2cb   :  { %1933 = vmatmul.mubr.f32.gmra.mrb[30].mxu1 %v2842_v61 }
 0x2de   :  { %v240_v58 = vpop.xlane.xlu1 %239 }
 0x2e2   :  { %v262_v59 = vpop.xlane.xlu1 %261 }
 0x346   :  { %v1857_v31 = vpop.f32.mrb[0].mxu1 }
 0x347   :  { %1013 = vst [vmem:[#allocation9 + $0x8] sm:$0xff] %v1857_v31  ;;  %v1303_v63 = vsub.f32 %v2077_v60, %v1857_v31  ;;  %v933_v5 = vpop.f32.mrb[1].mxu1  ;;  %v2087_v60 = vld [vmem:[%s3290_s0 + $0x58] sm:$0xff] }
 0x348   :  { %1012 = vst [vmem:[#allocation9] sm:$0xff] %v933_v5  ;;  %v1302_v26 = vsub.f32 %v2078_v6, %v933_v5  ;;  %v2088_v5 = vld [vmem:[%s3290_s0 + $0x50] sm:$0xff] }
 0x349   :  { %v1320_v57 = vmul.f32 %v1303_v63, %v1303_v63 }
 0x34a   :  { %v1319_v42 = vmul.f32 %v1302_v26, %v1302_v26 }
 0x34c   :  { %v1335_v16 = vadd.f32 %v1320_v57, %v1319_v42 }
 0x34e   :  { %v1860_v45 = vpop.f32.mrb[2].mxu1 }
 0x34f   :  { %1015 = vst [vmem:[#allocation9 + $0x18] sm:$0xff] %v1860_v45  ;;  %v943_v49 = vpop.f32.mrb[3].mxu1  ;;  %v1305_v51 = vsub.f32 %v2079_v1, %v1860_v45  ;;  %v2089_v1 = vld [vmem:[%s3290_s0 + $0x68] sm:$0xff] }
 0x350   :  { %1014 = vst [vmem:[#allocation9 + $0x10] sm:$0xff] %v943_v49  ;;  %v1304_v19 = vsub.f32 %v2080_v46, %v943_v49  ;;  %v2090_v46 = vld [vmem:[%s3290_s0 + $0x60] sm:$0xff] }
 0x351   :  { %v1322_v50 = vmul.f32 %v1305_v51, %v1305_v51 }
 0x352   :  { %v1321_v44 = vmul.f32 %v1304_v19, %v1304_v19 }
 0x354   :  { %v1336_v27 = vadd.f32 %v1335_v16, %v1321_v44 }
 0x356   :  { %v1863_v54 = vpop.f32.mrb[4].mxu1  ;;  %v1337_v13 = vadd.f32 %v1336_v27, %v1322_v50 }
 0x357   :  { %1017 = vst [vmem:[#allocation9 + $0x28] sm:$0xff] %v1863_v54  ;;  %v953_v2 = vpop.f32.mrb[5].mxu1  ;;  %v1307_v14 = vsub.f32 %v2081_v22, %v1863_v54  ;;  %v2091_v22 = vld [vmem:[%s3290_s0 + $0x78] sm:$0xff] }
 0x358   :  { %1016 = vst [vmem:[#allocation9 + $0x20] sm:$0xff] %v953_v2  ;;  %v1306_v20 = vsub.f32 %v2082_v15, %v953_v2  ;;  %v2092_v15 = vld [vmem:[%s3290_s0 + $0x70] sm:$0xff]  ;;  %s2246_s0 = smov [#allocation7]  }
 0x359   :  { %v1324_v24 = vmul.f32 %v1307_v14, %v1307_v14  ;;  %s1579_s29 = sshll.u32 %s2246_s0, 4  ;;  %s1580_s29 = int_to_ptr.vmem [resolvable:$true] %s1579_s29 }
 0x35a   :  { %v1323_v21 = vmul.f32 %v1306_v20, %v1306_v20  ;;  %s2123_s10 = scalar_lea.vmem %s1580_s29, 16  ;;  %s2127_s11 = scalar_lea.vmem %s1580_s29, 32 }
 0x35b   :  { %p2124_p8 = scmp.ne.s32.totalorder %s1580_s29, %s2123_s10  ;;  %p2128_p9 = scmp.lt.s32.totalorder %s1580_s29, %s1580_s29 }
 0x35c   :  { %v1338_v62 = vadd.f32 %v1337_v13, %v1323_v21  ;;  %v1367_v21 = vld [vmem:[#allocation3 + $0x8] sm:$0xff]  ;;  %p2129_p10 = scmp.lt.s32.totalorder %s2127_s11, %s2123_s10 }
 0x35e   :  { %v1866_v25 = vpop.f32.mrb[6].mxu1  ;;  %v1339_v38 = vadd.f32 %v1338_v62, %v1324_v24  ;;  %v1366_v24 = vld [vmem:[#allocation3] sm:$0xff]  ;;  %p2130_p11 = por %p2129_p10, %p2128_p9 }
 0x35f   :  { %1019 = vst [vmem:[#allocation9 + $0x38] sm:$0xff] %v1866_v25  ;;  %v963_v0 = vpop.f32.mrb[7].mxu1  ;;  %v1309_v29 = vsub.f32 %v2083_v3, %v1866_v25 }
 0x360   :  { %1018 = vst [vmem:[#allocation9 + $0x30] sm:$0xff] %v963_v0  ;;  %v1308_v52 = vsub.f32 %v2084_v35, %v963_v0  ;;  %p2131_p12 = pnand %p2130_p11, %p2124_p8 }
 0x361   :  { %v1326_v28 = vmul.f32 %v1309_v29, %v1309_v29  ;;  %v1382_v29 = vmul.f32 0.99, %v1366_v24 }
 0x362   :  { %v1325_v4 = vmul.f32 %v1308_v52, %v1308_v52 }
 0x364   :  { %v1340_v40 = vadd.f32 %v1339_v38, %v1325_v4  ;;  %v1383_v38 = vmul.f32 0.99, %v1367_v21  ;;  %v1368_v4 = vld [vmem:[#allocation3 + $0x10] sm:$0xff] }
 0x365   :  { %v1376_v21 = vld [vmem:[#allocation3 + $0x50] sm:$0xff] }
 0x366   :  { %v1869_v30 = vpop.f32.mrb[8].mxu1  ;;  %v1341_v7 = vadd.f32 %v1340_v40, %v1326_v28 }
 0x367   :  { %1021 = vst [vmem:[#allocation9 + $0x48] sm:$0xff] %v1869_v30  ;;  %v973_v8 = vpop.f32.mrb[9].mxu1  ;;  %v1311_v37 = vsub.f32 %v2085_v33, %v1869_v30 }
 0x368   :  { %1020 = vst [vmem:[#allocation9 + $0x40] sm:$0xff] %v973_v8  ;;  %v1310_v43 = vsub.f32 %v2086_v11, %v973_v8  ;;  %v3319_v8 = vld [vmem:[#allocation20_spill] sm:$0xff] }
 0x369   :  { %v1328_v23 = vmul.f32 %v1311_v37, %v1311_v37  ;;  %v1385_v33 = vmul.f32 0.99, %v3319_v8  ;;  %v1381_v8 = vld [vmem:[#allocation3 + $0x78] sm:$0xff] }
 0x36a   :  { %v1327_v39 = vmul.f32 %v1310_v43, %v1310_v43  ;;  %v1384_v43 = vmul.f32 0.99, %v1368_v4 }
 0x36c   :  { %v1342_v47 = vadd.f32 %v1341_v7, %v1327_v39 }
 0x36e   :  { %v1872_v58 = vpop.f32.mrb[10].mxu1  ;;  %v1343_v59 = vadd.f32 %v1342_v47, %v1328_v23 }
 0x36f   :  { %1023 = vst [vmem:[#allocation9 + $0x58] sm:$0xff] %v1872_v58  ;;  %v983_v31 = vpop.f32.mrb[11].mxu1  ;;  %v1313_v63 = vsub.f32 %v2087_v60, %v1872_v58 }
 0x370   :  { %1022 = vst [vmem:[#allocation9 + $0x50] sm:$0xff] %v983_v31  ;;  %v1312_v6 = vsub.f32 %v2088_v5, %v983_v31  ;;  %v2093_v5 = vld [vmem:[#allocation3 + $0x20] sm:$0xff] }
 0x371   :  { %v1330_v57 = vmul.f32 %v1313_v63, %v1313_v63 }
 0x372   :  { %v1329_v26 = vmul.f32 %v1312_v6, %v1312_v6  ;;  %v1386_v6 = vmul.f32 0.99, %v2093_v5 }
 0x374   :  { %v1344_v42 = vadd.f32 %v1343_v59, %v1329_v26  ;;  %v3320_v59 = vld [vmem:[#allocation21_spill] sm:$0xff] }
 0x375   :  { %v1387_v31 = vmul.f32 0.99, %v3320_v59 }
 0x376   :  { %v1875_v16 = vpop.f32.mrb[12].mxu1  ;;  %v1345_v45 = vadd.f32 %v1344_v42, %v1330_v57  ;;  %v1372_v57 = vld [vmem:[#allocation3 + $0x30] sm:$0xff] }
 0x377   :  { %1025 = vst [vmem:[#allocation9 + $0x68] sm:$0xff] %v1875_v16  ;;  %v993_v49 = vpop.f32.mrb[13].mxu1  ;;  %v1315_v51 = vsub.f32 %v2089_v1, %v1875_v16 }
 0x378   :  { %1024 = vst [vmem:[#allocation9 + $0x60] sm:$0xff] %v993_v49  ;;  %v1314_v19 = vsub.f32 %v2090_v46, %v993_v49  ;;  %v3321_v49 = vld [vmem:[#allocation22_spill] sm:$0xff] }
 0x379   :  { %v1332_v50 = vmul.f32 %v1315_v51, %v1315_v51  ;;  %v1389_v1 = vmul.f32 0.99, %v3321_v49 }
 0x37a   :  { %v1331_v44 = vmul.f32 %v1314_v19, %v1314_v19  ;;  %v1388_v19 = vmul.f32 0.99, %v1372_v57  ;;  %v2096_v57 = vld [vmem:[#allocation6 + $0x28] sm:$0xff] }
 0x37c   :  { %v1346_v27 = vadd.f32 %v1345_v45, %v1331_v44 }
 0x37e   :  { %v1878_v54 = vpop.f32.mrb[14].mxu1  ;;  %v1347_v13 = vadd.f32 %v1346_v27, %v1332_v50  ;;  %v1374_v50 = vld [vmem:[#allocation3 + $0x40] sm:$0xff] }
 0x37f   :  { %1027 = vst [vmem:[#allocation9 + $0x78] sm:$0xff] %v1878_v54  ;;  %v1003_v2 = vpop.f32.mrb[15].mxu1  ;;  %v1317_v14 = vsub.f32 %v2091_v22, %v1878_v54 }
 0x380   :  { %1026 = vst [vmem:[#allocation9 + $0x70] sm:$0xff] %v1003_v2  ;;  %v1316_v20 = vsub.f32 %v2092_v15, %v1003_v2  ;;  %v1377_v15 = vld [vmem:[#allocation3 + $0x58] sm:$0xff] }
 0x381   :  { %v1334_v3 = vmul.f32 %v1317_v14, %v1317_v14  ;;  %v1390_v14 = vmul.f32 0.99, %v1374_v50  ;;  %v229_v50 = vmul.f32 %v2665_v48, %v2665_v48 }
 0x382   :  { %v1333_v62 = vmul.f32 %v1316_v20, %v1316_v20  ;;  %v1913_v25 = vpop.f32.mrb[16].mxu1 }
 0x383   :  { %v1110_v0 = vpop.f32.mrb[17].mxu1  ;;  %v1415_v52 = vmul.f32 0.01, %v1913_v25  ;;  %v1393_v25 = vmul.f32 0.99, %v1377_v15 }
 0x384   :  { %v1348_v35 = vadd.f32 %v1347_v13, %v1333_v62  ;;  %v1414_v28 = vmul.f32 0.01, %v1110_v0  ;;  %v1391_v13 = vmul.f32 0.99, %v2663_v17  ;;  %v1379_v17 = vld [vmem:[#allocation3 + $0x68] sm:$0xff] }
 0x385   :  { %v1431_v7 = vadd.f32 %v1415_v52, %v1383_v38 }
 0x386   :  { %v1916_v40 = vpop.f32.mrb[18].mxu1  ;;  %v1349_v30 = vadd.f32 %v1348_v35, %v1334_v3  ;;  %v1430_v11 = vadd.f32 %v1414_v28, %v1382_v29  ;;  %v1392_v3 = vmul.f32 0.99, %v1376_v21  ;;  %v1378_v35 = vld [vmem:[#allocation3 + $0x60] sm:$0xff]  ;;  %v1395_v28 = vmul.f32 0.99, %v1379_v17 }
 0x387   :  { %v1120_v37 = vpop.f32.mrb[19].mxu1  ;;  %1447 = vst [vmem:[#allocation10 + $0x8] sm:$0xff] %v1431_v7  ;;  %v1417_v39 = vmul.f32 0.01, %v1916_v40  ;;  %v1394_v7 = vmul.f32 0.99, %v1378_v35 }
 0x388   :  { %1350 = vadd.xlane.f32.xlu0 %v1349_v30  ;;  %1446 = vst [vmem:[#allocation10] sm:$0xff] %v1430_v11  ;;  %v1416_v23 = vmul.f32 0.01, %v1120_v37  ;;  %v1380_v37 = vld [vmem:[#allocation3 + $0x70] sm:$0xff] }
 0x389   :  { %v1433_v58 = vadd.f32 %v1417_v39, %v1385_v33  ;;  %v1397_v39 = vmul.f32 0.99, %v1381_v8 }
 0x38a   :  { %v1919_v47 = vpop.f32.mrb[20].mxu1  ;;  %v1432_v63 = vadd.f32 %v1416_v23, %v1384_v43 }
 0x38b   :  { %v1130_v60 = vpop.f32.mrb[21].mxu1  ;;  %1449 = vst [vmem:[#allocation10 + $0x18] sm:$0xff] %v1433_v58  ;;  %v1419_v26 = vmul.f32 0.01, %v1919_v47  ;;  %v1396_v58 = vmul.f32 0.99, %v1380_v37 }
 0x38c   :  { %1255 = vadd.xlane.f32.xlu0 %v2797_v9  ;;  %1448 = vst [vmem:[#allocation10 + $0x10] sm:$0xff] %v1432_v63  ;;  %v1418_v42 = vmul.f32 0.01, %v1130_v60  ;;  %v2094_v63 = vld [vmem:[#allocation6 + $0x10] sm:$0xff] }
 0x38d   :  { %v1435_v45 = vadd.f32 %v1419_v26, %v1387_v31  ;;  %v219_v5 = vmul.f32 %v2094_v63, %v2094_v63 }
 0x38e   :  { %v1922_v16 = vpop.f32.mrb[22].mxu1  ;;  %v1434_v46 = vadd.f32 %v1418_v42, %v1386_v6  ;;  %v2095_v6 = vld [vmem:[#allocation6 + $0x20] sm:$0xff]  ;;  %v222_v42 = vmul.f32 %v2096_v57, %v2096_v57 }
 0x38f   :  { %v1140_v51 = vpop.f32.mrb[23].mxu1  ;;  %1451 = vst [vmem:[#allocation10 + $0x28] sm:$0xff] %v1435_v45  ;;  %v1421_v44 = vmul.f32 0.01, %v1922_v16  ;;  %v221_v26 = vmul.f32 %v2095_v6, %v2095_v6  ;;  %v2098_v45 = vld [vmem:[#allocation6 + $0x38] sm:$0xff] }
 0x390   :  { %1257 = vadd.xlane.f32.xlu0 %v2802_v12  ;;  %1450 = vst [vmem:[#allocation10 + $0x20] sm:$0xff] %v1434_v46  ;;  %v1420_v27 = vmul.f32 0.01, %v1140_v51  ;;  %v224_v49 = vmul.f32 %v2098_v45, %v2098_v45  ;;  %v2100_v46 = vld [vmem:[#allocation6 + $0x50] sm:$0xff] }
 0x391   :  { %v1437_v54 = vadd.f32 %v1421_v44, %v1389_v1  ;;  %v2099_v1 = vld [vmem:[#allocation6 + $0x40] sm:$0xff]  ;;  %v228_v44 = vmul.f32 %v2672_v18, %v2672_v18 }
 0x392   :  { %v1925_v9 = vpop.f32.mrb[24].mxu1  ;;  %v1436_v22 = vadd.f32 %v1420_v27, %v1388_v19  ;;  %v225_v51 = vmul.f32 %v2099_v1, %v2099_v1  ;;  %v227_v19 = vmul.f32 %v2100_v46, %v2100_v46  ;;  %v230_v27 = vmul.f32 %v2678_v41, %v2678_v41 }
 0x393   :  { %v1150_v2 = vpop.f32.mrb[25].mxu1  ;;  %1453 = vst [vmem:[#allocation10 + $0x38] sm:$0xff] %v1437_v54  ;;  %v1423_v20 = vmul.f32 0.01, %v1925_v9  ;;  %v232_v9 = vmul.f32 %v2687_v32, %v2687_v32 }
 0x394   :  { %1259 = vadd.xlane.f32.xlu0 %v2810_v36  ;;  %1452 = vst [vmem:[#allocation10 + $0x30] sm:$0xff] %v1436_v22  ;;  %v1422_v12 = vmul.f32 0.01, %v1150_v2 }
 0x395   :  { %v1439_v62 = vadd.f32 %v1423_v20, %v1391_v13 }
 0x396   :  { %v1928_v24 = vpop.f32.mrb[26].mxu1  ;;  %v1438_v0 = vadd.f32 %v1422_v12, %v1390_v14 }
 0x397   :  { %v1160_v38 = vpop.f32.mrb[27].mxu1  ;;  %1455 = vst [vmem:[#allocation10 + $0x48] sm:$0xff] %v1439_v62  ;;  %v1425_v29 = vmul.f32 0.01, %v1928_v24 }
 0x398   :  { %1261 = vadd.xlane.f32.xlu0 %v2818_v53  ;;  %1454 = vst [vmem:[#allocation10 + $0x40] sm:$0xff] %v1438_v0  ;;  %v1424_v36 = vmul.f32 0.01, %v1160_v38 }
 0x399   :  { %v1441_v4 = vadd.f32 %v1425_v29, %v1393_v25 }
 0x39a   :  { %v1931_v52 = vpop.f32.mrb[28].mxu1  ;;  %v1440_v30 = vadd.f32 %v1424_v36, %v1392_v3 }
 0x39b   :  { %v1170_v40 = vpop.f32.mrb[29].mxu1  ;;  %1457 = vst [vmem:[#allocation10 + $0x58] sm:$0xff] %v1441_v4  ;;  %v1427_v33 = vmul.f32 0.01, %v1931_v52 }
 0x39c   :  { %1263 = vadd.xlane.f32.xlu0 %v2826_v55  ;;  %1456 = vst [vmem:[#allocation10 + $0x50] sm:$0xff] %v1440_v30  ;;  %v1426_v53 = vmul.f32 0.01, %v1170_v40 }
 0x39d   :  { %v1443_v43 = vadd.f32 %v1427_v33, %v1395_v28 }
 0x39e   :  { %v1934_v11 = vpop.f32.mrb[30].mxu1  ;;  %v1442_v47 = vadd.f32 %v1426_v53, %v1394_v7 }
 0x39f   :  { %v1180_v23 = vpop.f32.mrb[31].mxu1  ;;  %1459 = vst [vmem:[#allocation10 + $0x68] sm:$0xff] %v1443_v43  ;;  %v1429_v59 = vmul.f32 0.01, %v1934_v11 }
 0x3a0   :  { %1265 = vadd.xlane.f32.xlu0 %v2834_v56  ;;  %1458 = vst [vmem:[#allocation10 + $0x60] sm:$0xff] %v1442_v47  ;;  %v1428_v31 = vmul.f32 0.01, %v1180_v23  ;;  %v2097_v56 = vld [vmem:[#allocation6 + $0x30] sm:$0xff] }
 0x3a1   :  { %v1445_v60 = vadd.f32 %v1429_v59, %v1397_v39  ;;  %v223_v16 = vmul.f32 %v2097_v56, %v2097_v56 }
 0x3a2   :  { %v1444_v55 = vadd.f32 %v1428_v31, %v1396_v58 }
 0x3a3   :  { %1461 = vst [vmem:[#allocation10 + $0x78] sm:$0xff] %v1445_v60 }
 0x3a4   :  { %1267 = vadd.xlane.f32.xlu0 %v2842_v61  ;;  %1460 = vst [vmem:[#allocation10 + $0x70] sm:$0xff] %v1444_v55  ;;  %v226_v61 = vmul.f32 %v2668_v10, %v2668_v10 }
 0x3a8   :  { %237 = vadd.xlane.f32.xlu0 %v219_v5 }
 0x3ac   :  { %241 = vadd.xlane.f32.xlu0 %v221_v26 }
 0x3b0   :  { %243 = vadd.xlane.f32.xlu0 %v222_v42 }
 0x3b4   :  { %245 = vadd.xlane.f32.xlu0 %v223_v16 }
 0x3b8   :  { %247 = vadd.xlane.f32.xlu0 %v224_v49 }
 0x3bc   :  { %249 = vadd.xlane.f32.xlu0 %v225_v51 }
 0x3c0   :  { %251 = vadd.xlane.f32.xlu0 %v226_v61 }
 0x3c4   :  { %253 = vadd.xlane.f32.xlu0 %v227_v19 }
 0x3c8   :  { %255 = vadd.xlane.f32.xlu0 %v228_v44 }
 0x3cc   :  { %257 = vadd.xlane.f32.xlu0 %v229_v50 }
 0x3d0   :  { %259 = vadd.xlane.f32.xlu0 %v230_v27 }
 0x3d4   :  { %263 = vadd.xlane.f32.xlu0 %v232_v9 }
 0x3d5   :  { %2134 = shalt.err (!%p2131_p12)
}
 0x3d6   :  { %s2135_s14 = scalar_lea.hbm %s3294_s4, 16 }
 0x3d7   :  { %p2136_p13 = scmp.ne.s32.totalorder %s3294_s4, %s2135_s14  ;;  %p2139_p0 = scmp.lt.u32.totalorder %s2135_s14, %s3294_s4 }
 0x3d9   :  { %p2141_p1 = pnand %p2139_p0, %p2136_p13 }
 0x3db   :  { %2144 = shalt.err (!%p2141_p1)
}
 0x3dc   :  { %1582 = dma.vmem_to_hbm [thread:$0]  %s1580_s29, 16, %s3294_s4, [#allocation8]  }
 0x3dd   :  { %s2145_s23 = scalar_lea.vmem %s3086_s9, 2048  ;;  %p2150_p3 = scmp.lt.s32.totalorder %s3086_s9, %s3086_s9 }
 0x3de   :  { %p2146_p2 = scmp.ne.s32.totalorder %s3086_s9, %s2145_s23  ;;  %p2151_p4 = scmp.lt.s32.totalorder %s2145_s23, %s2145_s23 }
 0x3e0   :  { %p2152_p5 = por %p2151_p4, %p2150_p3 }
 0x3e2   :  { %p2153_p6 = pnand %p2152_p5, %p2146_p2 }
 0x3e4   :  { %2156 = shalt.err (!%p2153_p6)
}
 0x3e5   :  { %s2157_s25 = scalar_lea.hbm %s3296_s6, 2048 }
 0x3e6   :  { %p2158_p7 = scmp.ne.s32.totalorder %s3296_s6, %s2157_s25  ;;  %p2161_p8 = scmp.lt.u32.totalorder %s2157_s25, %s3296_s6 }
 0x3e8   :  { %p2163_p9 = pnand %p2161_p8, %p2158_p7 }
 0x3ea   :  { %2166 = shalt.err (!%p2163_p9)
}
 0x3eb   :  { %1606 = dma.vmem_to_hbm [thread:$0]  %s3086_s9, 2048, %s3296_s6, [#allocation11], %s2242_s15, %s2242_s15, %s2243_s16  }
 0x3ec   :  { %s2248_s30 = smov [#allocation6]   ;;  %s2249_s11 = smov [#allocation9]  }
 0x3ed   :  { %s1566_s10 = sshll.u32 %s2248_s30, 4  ;;  %s1588_s12 = sshll.u32 %s2249_s11, 4  ;;  %s1567_s10 = int_to_ptr.vmem [resolvable:$true] %s1566_s10  ;;  %s3120_s12 = int_to_ptr.vmem [resolvable:$true] %s1588_s12 }
 0x3ee   :  { %s2167_s13 = scalar_lea.vmem %s1567_s10, 2048  ;;  %p2172_p11 = scmp.lt.s32.totalorder %s1567_s10, %s1567_s10 }
 0x3ef   :  { %p2168_p10 = scmp.ne.s32.totalorder %s1567_s10, %s2167_s13  ;;  %p2173_p12 = scmp.lt.s32.totalorder %s2167_s13, %s2167_s13 }
 0x3f1   :  { %p2174_p13 = por %p2173_p12, %p2172_p11 }
 0x3f3   :  { %p2175_p0 = pnand %p2174_p13, %p2168_p10 }
 0x3f5   :  { %2178 = shalt.err (!%p2175_p0)
}
 0x3f6   :  { %s2179_s18 = scalar_lea.hbm %s3293_s3, 2048 }
 0x3f7   :  { %p2180_p1 = scmp.ne.s32.totalorder %s3293_s3, %s2179_s18  ;;  %p2183_p2 = scmp.lt.u32.totalorder %s2179_s18, %s3293_s3 }
 0x3f9   :  { %p2185_p3 = pnand %p2183_p2, %p2180_p1 }
 0x3fb   :  { %2188 = shalt.err (!%p2185_p3)
}
 0x3fc   :  { %1572 = dma.vmem_to_hbm [thread:$0]  %s1567_s10, 2048, %s3293_s3, [#allocation5], %s2242_s15, %s2242_s15, %s2243_s16  }
 0x3fd   :  { %s2189_s23 = scalar_lea.vmem %s3120_s12, 2048  ;;  %p2194_p5 = scmp.lt.s32.totalorder %s3120_s12, %s3120_s12 }
 0x3fe   :  { %p2190_p4 = scmp.ne.s32.totalorder %s3120_s12, %s2189_s23  ;;  %p2195_p6 = scmp.lt.s32.totalorder %s2189_s23, %s2189_s23 }
 0x400   :  { %p2196_p7 = por %p2195_p6, %p2194_p5 }
 0x402   :  { %p2197_p8 = pnand %p2196_p7, %p2190_p4 }
 0x404   :  { %2200 = shalt.err (!%p2197_p8)
}
 0x405   :  { %s2201_s25 = scalar_lea.hbm %s3295_s5, 2048 }
 0x406   :  { %p2202_p9 = scmp.ne.s32.totalorder %s3295_s5, %s2201_s25  ;;  %p2205_p10 = scmp.lt.u32.totalorder %s2201_s25, %s3295_s5 }
 0x408   :  { %p2207_p11 = pnand %p2205_p10, %p2202_p9 }
 0x40a   :  { %2210 = shalt.err (!%p2207_p11)
}
 0x40b   :  { %1594 = dma.vmem_to_hbm [thread:$0]  %s3120_s12, 2048, %s3295_s5, [#allocation8], %s2242_s15, %s2242_s15, %s2243_s16  }
 0x40c   :  { %v1230_v18 = vld [vmem:[%s3297_s7 + $0x48] sm:$0xff]  ;;  %v1231_v13 = vld [vmem:[%s3297_s7 + $0x50] sm:$0xff]  ;;  %v1232_v21 = vld [vmem:[%s3297_s7 + $0x58] sm:$0xff]  ;;  %s2250_s9 = smov [#allocation12]  }
 0x40d   :  { %v1471_v20 = vld [vmem:[%s3292_s2 + $0x48] sm:$0xff]  ;;  %v1472_v0 = vld [vmem:[%s3292_s2 + $0x50] sm:$0xff]  ;;  %v1233_v3 = vld [vmem:[%s3297_s7 + $0x60] sm:$0xff]  ;;  %s1615_s20 = sshll.u32 %s2250_s9, 4  ;;  %s1616_s20 = int_to_ptr.vmem [resolvable:$true] %s1615_s20 }
 0x40e   :  { %v1487_v62 = vmul.f32 0.99, %v1471_v20  ;;  %v1488_v36 = vmul.f32 0.99, %v1472_v0  ;;  %v1473_v28 = vld [vmem:[%s3292_s2 + $0x58] sm:$0xff]  ;;  %v1234_v40 = vld [vmem:[%s3297_s7 + $0x68] sm:$0xff]  ;;  %p2216_p13 = scmp.lt.s32.totalorder %s1616_s20, %s1616_s20 }
 0x40f   :  { %v1489_v33 = vmul.f32 0.99, %v1473_v28  ;;  %v1474_v11 = vld [vmem:[%s3292_s2 + $0x60] sm:$0xff]  ;;  %v1235_v43 = vld [vmem:[%s3297_s7 + $0x70] sm:$0xff]  ;;  %v1475_v60 = vld [vmem:[%s3292_s2 + $0x68] sm:$0xff]  ;;  %s2215_s21 = scalar_lea.vmem %s1616_s20, 32 }
 0x410   :  { %v1490_v58 = vmul.f32 0.99, %v1474_v11  ;;  %v1236_v55 = vld [vmem:[%s3297_s7 + $0x78] sm:$0xff]  ;;  %v1491_v26 = vmul.f32 0.99, %v1475_v60  ;;  %v1476_v56 = vld [vmem:[%s3292_s2 + $0x70] sm:$0xff] }
 0x411   :  { %v1492_v1 = vmul.f32 0.99, %v1476_v56  ;;  %v1477_v61 = vld [vmem:[%s3292_s2 + $0x78] sm:$0xff] }
 0x412   :  { %v1493_v50 = vmul.f32 0.99, %v1477_v61 }
 0x415   :  { %v1351_v48 = vpop.xlane.xlu0 %1350 }
 0x416   :  { %v1352_v10 = vrot.slane %v1351_v48, 4 }
 0x418   :  { %v1353_v41 = vadd.f32 %v1352_v10, %v1351_v48 }
 0x419   :  { %v1256_v32 = vpop.xlane.xlu0 %1255 }
 0x41a   :  { %v1354_v34 = vrot.slane %v1353_v41, 2  ;;  %v1278_v54 = vadd.f32 %v1256_v32, %v1230_v18 }
 0x41c   :  { %1295 = vst.msk [vmem:[%s3297_s7 + $0x48] sm:$0xff] %vm265_vm0, %v1278_v54  ;;  %v1355_v2 = vadd.f32 %v1354_v34, %v1353_v41 }
 0x41d   :  { %v1258_v22 = vpop.xlane.xlu0 %1257 }
 0x41e   :  { %v1279_v14 = vadd.f32 %v1258_v22, %v1231_v13  ;;  %v1356_v15 = vrot.slane %v1355_v2, 1  ;;  %v1318_v13 = vld [vmem:[#allocation12] sm:$0x1] }
 0x420   :  { %1296 = vst.msk [vmem:[%s3297_s7 + $0x50] sm:$0xff] %vm265_vm0, %v1279_v14  ;;  %v1357_v12 = vadd.f32 %v1356_v15, %v1355_v2 }
 0x421   :  { %v1260_v24 = vpop.xlane.xlu0 %1259 }
 0x422   :  { %v1280_v25 = vadd.f32 %v1260_v24, %v1232_v21  ;;  %2031 = vpush %v1357_v12 }
 0x423   :  { %v1503_v38 = vld [vmem:[%s3297_s7 + $0x48] sm:$0xff] }
 0x424   :  { %v1519_v17 = vmul.f32 0.01, %v1503_v38  ;;  %1297 = vst.msk [vmem:[%s3297_s7 + $0x58] sm:$0xff] %vm265_vm0, %v1280_v25 }
 0x425   :  { %v1262_v29 = vpop.xlane.xlu0 %1261 }
 0x426   :  { %v1535_v35 = vadd.f32 %v1519_v17, %v1487_v62  ;;  %v1281_v52 = vadd.f32 %v1262_v29, %v1233_v3 }
 0x427   :  { %v1504_v4 = vld [vmem:[%s3297_s7 + $0x50] sm:$0xff] }
 0x428   :  { %1551 = vst.msk [vmem:[%s3297_s7 + $0x48] sm:$0xff] %vm265_vm0, %v1535_v35  ;;  %v1520_v30 = vmul.f32 0.01, %v1504_v4  ;;  %1298 = vst.msk [vmem:[%s3297_s7 + $0x60] sm:$0xff] %vm265_vm0, %v1281_v52 }
 0x429   :  { %v1264_v7 = vpop.xlane.xlu0 %1263 }
 0x42a   :  { %v1536_v8 = vadd.f32 %v1520_v30, %v1488_v36  ;;  %v1282_v37 = vadd.f32 %v1264_v7, %v1234_v40 }
 0x42b   :  { %v1505_v53 = vld [vmem:[%s3297_s7 + $0x58] sm:$0xff] }
 0x42c   :  { %1552 = vst.msk [vmem:[%s3297_s7 + $0x50] sm:$0xff] %vm265_vm0, %v1536_v8  ;;  %v1521_v39 = vmul.f32 0.01, %v1505_v53  ;;  %1299 = vst.msk [vmem:[%s3297_s7 + $0x68] sm:$0xff] %vm265_vm0, %v1282_v37 }
 0x42d   :  { %v1266_v23 = vpop.xlane.xlu0 %1265 }
 0x42e   :  { %v1537_v47 = vadd.f32 %v1521_v39, %v1489_v33  ;;  %v1283_v59 = vadd.f32 %v1266_v23, %v1235_v43 }
 0x42f   :  { %v1506_v31 = vld [vmem:[%s3297_s7 + $0x60] sm:$0xff] }
 0x430   :  { %1553 = vst.msk [vmem:[%s3297_s7 + $0x58] sm:$0xff] %vm265_vm0, %v1537_v47  ;;  %v1522_v63 = vmul.f32 0.01, %v1506_v31  ;;  %1300 = vst.msk [vmem:[%s3297_s7 + $0x70] sm:$0xff] %vm265_vm0, %v1283_v59 }
 0x431   :  { %v1268_v5 = vpop.xlane.xlu0 %1267 }
 0x432   :  { %v1538_v6 = vadd.f32 %v1522_v63, %v1490_v58  ;;  %v1284_v57 = vadd.f32 %v1268_v5, %v1236_v55 }
 0x433   :  { %v1507_v42 = vld [vmem:[%s3297_s7 + $0x68] sm:$0xff] }
 0x434   :  { %1554 = vst.msk [vmem:[%s3297_s7 + $0x60] sm:$0xff] %vm265_vm0, %v1538_v6  ;;  %v1523_v16 = vmul.f32 0.01, %v1507_v42  ;;  %1301 = vst.msk [vmem:[%s3297_s7 + $0x78] sm:$0xff] %vm265_vm0, %v1284_v57 }
 0x435   :  { %v238_v45 = vpop.xlane.xlu0 %237 }
 0x436   :  { %v1539_v49 = vadd.f32 %v1523_v16, %v1491_v26 }
 0x437   :  { %v1508_v51 = vld [vmem:[%s3297_s7 + $0x70] sm:$0xff] }
 0x438   :  { %1555 = vst.msk [vmem:[%s3297_s7 + $0x68] sm:$0xff] %vm265_vm0, %v1539_v49  ;;  %v1524_v46 = vmul.f32 0.01, %v1508_v51 }
 0x439   :  { %v242_v19 = vpop.xlane.xlu0 %241 }
 0x43a   :  { %v1540_v44 = vadd.f32 %v1524_v46, %v1492_v1 }
 0x43b   :  { %v1509_v27 = vld [vmem:[%s3297_s7 + $0x78] sm:$0xff] }
 0x43c   :  { %1556 = vst.msk [vmem:[%s3297_s7 + $0x70] sm:$0xff] %vm265_vm0, %v1540_v44  ;;  %v1525_v9 = vmul.f32 0.01, %v1509_v27 }
 0x43d   :  { %v244_v48 = vpop.xlane.xlu0 %243 }
 0x43e   :  { %v1541_v10 = vadd.f32 %v1525_v9, %v1493_v50 }
 0x440   :  { %1557 = vst.msk [vmem:[%s3297_s7 + $0x78] sm:$0xff] %vm265_vm0, %v1541_v10  ;;  %s2211_s7 = scalar_lea.vmem %s1616_s20, 16 }
 0x441   :  { %v246_v18 = vpop.xlane.xlu0 %245  ;;  %p2212_p12 = scmp.ne.s32.totalorder %s1616_s20, %s2211_s7  ;;  %p2217_p0 = scmp.lt.s32.totalorder %s2215_s21, %s2211_s7 }
 0x443   :  { %p2218_p1 = por %p2217_p0, %p2216_p13 }
 0x445   :  { %v248_v41 = vpop.xlane.xlu0 %247  ;;  %p2219_p2 = pnand %p2218_p1, %p2212_p12 }
 0x449   :  { %v250_v32 = vpop.xlane.xlu0 %249 }
 0x44d   :  { %v252_v34 = vpop.xlane.xlu0 %251 }
 0x451   :  { %v254_v54 = vpop.xlane.xlu0 %253 }
 0x453   :  { %s2032_s6 = spop %2031 }
 0x454   :  { %v1359_v2 = vstv %s2032_s6 }
 0x455   :  { %v1360_v22 = vadd.f32 %v1359_v2, %v1318_v13  ;;  %v256_v14 = vpop.xlane.xlu0 %255 }
 0x457   :  { %1362 = vst.msk [vmem:[#allocation12] sm:$0x1] %vm314_vm9, %v1360_v22 }
 0x459   :  { %v258_v15 = vpop.xlane.xlu0 %257 }
 0x45d   :  { %v260_v20 = vpop.xlane.xlu0 %259 }
 0x45e   :  { %v1558_v21 = vld [vmem:[#allocation12] sm:$0x1] }
 0x45f   :  { %v1559_v12 = vmul.f32 0.00390625, %v1558_v21 }
 0x461   :  { %v264_v24 = vpop.xlane.xlu0 %263  ;;  %1560 = vst.msk [vmem:[#allocation12] sm:$0x1] %vm314_vm9, %v1559_v12 }
 0x462   :  { %2222 = shalt.err (!%p2219_p2)
}
 0x463   :  { %s2223_s24 = scalar_lea.hbm %s3298_s8, 16 }
 0x464   :  { %p2224_p3 = scmp.ne.s32.totalorder %s3298_s8, %s2223_s24  ;;  %p2227_p4 = scmp.lt.u32.totalorder %s2223_s24, %s3298_s8 }
 0x466   :  { %p2229_p5 = pnand %p2227_p4, %p2224_p3 }
 0x468   :  { %2232 = shalt.err (!%p2229_p5)
}
 0x469   :  { %1618 = dma.vmem_to_hbm [thread:$0]  %s1616_s20, 16, %s3298_s8, [#allocation11]  }
 0x46a   :  { %2235 = dma.done.wait [#allocation5], 2048  }
 0x46b   :  { %2236 = vsyncadd [#allocation5], 4294965248 }
 0x46c   :  { %2237 = dma.done.wait [#allocation8], 2064  }
 0x46d   :  { %2238 = vsyncadd [#allocation8], 4294965232 }
 0x46e   :  { %2239 = dma.done.wait [#allocation11], 2064  }
 0x46f   :  { %2240 = vsyncadd [#allocation11], 4294965232 }
 0x470   :  { %1636 = vsyncpa [#allocation4], 1 }
 0x471   :  { %1637 = vsyncpa [#allocation5], 1 }
 0x472   :  { %1638 = vsyncpa [#allocation8], 1 }
 0x473   :  { %1639 = vsyncpa [#allocation11], 1 }

</bundles_post_ra>
